<compile_context>
chip_gen: v7x
topology: tpu7x:2x2x1
jax: 0.10.0
libtpu: 0.0.40
codegen_flags: <defaults>
</compile_context>

<pallas_src>
import math

import jax
import jax.numpy as jnp
from jax.experimental import pallas as pl
from jax.experimental.pallas import tpu as pltpu

DIM = 32                     # embedding dim
HEADS = 8                    # num_heads
HEAD_DIM = DIM // HEADS      # 4
MLP_HIDDEN = int(DIM * 4.0)  # 128
EPS = 1e-5                   # nn.LayerNorm default eps
DP = 128                     # lane-padded embedding dim (multiple of 128)


def transformer_block_kernel(x_ref, ln1w_ref, ln1b_ref, wqkv_ref, bqkv_ref,
                             wo_ref, bo_ref, ln2w_ref, ln2b_ref,
                             w1_ref, b1_ref, w2_ref, b2_ref, o_ref):
    tb, s, dp = x_ref.shape
    rows = tb * s
    # Work on a lane-dense (rows, 128) slab; columns >= DIM are zero by construction.
    x = x_ref[...].reshape(rows, dp).astype(jnp.float32)

    # Lane mask selecting the true embedding columns (first DIM of DP).
    lane = jax.lax.broadcasted_iota(jnp.int32, (1, dp), 1)
    mask = (lane < DIM).astype(jnp.float32)
    inv_d = 1.0 / DIM

    def layer_norm(t, w, b):
        mu = jnp.sum(t, axis=-1, keepdims=True) * inv_d          # pad cols are zero
        c = (t - mu) * mask                                      # re-zero pad cols
        var = jnp.sum(c * c, axis=-1, keepdims=True) * inv_d
        return c * jax.lax.rsqrt(var + EPS) * w + b              # w,b zero on pad cols

    # ---- LayerNorm 1 ----
    x1 = layer_norm(x, ln1w_ref[...], ln1b_ref[...])

    # ---- Multi-head self-attention ----
    # wqkv_ref is pre-transposed to (DP, 3*DIM) with the 1/sqrt(head_dim) scale already
    # folded into the Q columns (and the Q part of bqkv), so no per-head scaling here.
    qkv = jnp.dot(x1, wqkv_ref[...], preferred_element_type=jnp.float32) + bqkv_ref[...]
    q = qkv[:, 0 * DIM:1 * DIM].reshape(tb, s, DIM)
    k = qkv[:, 1 * DIM:2 * DIM].reshape(tb, s, DIM)
    v = qkv[:, 2 * DIM:3 * DIM].reshape(tb, s, DIM)

    wo = wo_ref[...]                                             # (DIM, DP), pre-transposed
    attn = jnp.zeros((rows, dp), jnp.float32)
    for h in range(HEADS):                                       # static unroll over heads
        sl = slice(h * HEAD_DIM, (h + 1) * HEAD_DIM)
        qh, kh, vh = q[..., sl], k[..., sl], v[..., sl]          # (TB, S, hd)
        sc = jnp.einsum("bqd,bkd->bqk", qh, kh,
                        preferred_element_type=jnp.float32)      # (TB, S, S), no k-transpose
        sc = sc - jnp.max(sc, axis=-1, keepdims=True)
        e = jnp.exp(sc)
        p = e * pl.reciprocal(jnp.sum(e, axis=-1, keepdims=True), approx=True)
        oh = jnp.einsum("bqk,bkd->bqd", p, vh,
                        preferred_element_type=jnp.float32)      # (TB, S, hd)
        # Fold this head straight into the output projection (avoids per-head concat).
        attn = attn + jnp.dot(oh.reshape(rows, HEAD_DIM), wo[sl, :],
                              preferred_element_type=jnp.float32)
    attn = attn + bo_ref[...]

    # residual (dropout p=0.0 -> identity)
    x = x + attn

    # ---- LayerNorm 2 ----
    x2 = layer_norm(x, ln2w_ref[...], ln2b_ref[...])

    # ---- MLP: Linear -> ReLU -> Linear (dropouts are identity) ----
    h1 = jnp.dot(x2, w1_ref[...], preferred_element_type=jnp.float32) + b1_ref[...]
    h1 = jnp.maximum(h1, 0.0)
    mlp = jnp.dot(h1, w2_ref[...], preferred_element_type=jnp.float32) + b2_ref[...]

    o_ref[...] = (x + mlp).reshape(tb, s, dp).astype(o_ref.dtype)


def pack_params(p):
    """One-time parameter preprocessing (not per call):
    transpose every weight to its in-kernel orientation, fold the attention scale into
    the Q projection, and zero-pad the embedding dim from DIM to DP=128 lanes."""
    scale = 1.0 / math.sqrt(HEAD_DIM)
    pad_d = DP - DIM

    wqkv_t = p["wqkv"].T                                   # (DIM, 3*DIM)
    wqkv_t = wqkv_t.at[:, :DIM].multiply(scale)            # fold scale into Q columns
    wqkv_t = jnp.pad(wqkv_t, ((0, pad_d), (0, 0)))         # (DP, 3*DIM), zero pad rows
    bqkv = p["bqkv"].at[:, :DIM].multiply(scale)           # (1, 3*DIM)

    def pad_last(a):
        return jnp.pad(a, ((0, 0),) * (a.ndim - 1) + ((0, pad_d),))

    return {
        "ln1w": pad_last(p["ln1w"]), "ln1b": pad_last(p["ln1b"]),
        "wqkv_t": wqkv_t, "bqkv": bqkv,
        "wo_t": pad_last(p["wo"].T),                        # (DIM, DP)
        "bo": pad_last(p["bo"]),
        "ln2w": pad_last(p["ln2w"]), "ln2b": pad_last(p["ln2b"]),
        "w1_t": jnp.pad(p["w1"].T, ((0, pad_d), (0, 0))),   # (DP, MLP_HIDDEN)
        "b1": p["b1"],
        "w2_t": pad_last(p["w2"].T),                        # (MLP_HIDDEN, DP)
        "b2": pad_last(p["b2"]),
    }


def transformer_block(x, packed, *, batch_block=None):
    B, S, D = x.shape
    assert D == DIM
    tb = B if batch_block is None else min(batch_block, B)   # default: whole batch per step
    assert B % tb == 0
    grid = (B // tb,)

    # Lane-pad the activations once in the wrapper (zeros in columns DIM..DP-1).
    x_p = jnp.pad(x, ((0, 0), (0, 0), (0, DP - DIM)))

    def full_spec(arr):
        shp = arr.shape
        return pl.BlockSpec(shp, lambda b: (0,) * len(shp))

    weights = [packed["ln1w"], packed["ln1b"], packed["wqkv_t"], packed["bqkv"],
               packed["wo_t"], packed["bo"], packed["ln2w"], packed["ln2b"],
               packed["w1_t"], packed["b1"], packed["w2_t"], packed["b2"]]

    in_specs = [pl.BlockSpec((tb, S, DP), lambda b: (b, 0, 0))] + [full_spec(w) for w in weights]

    out_p = pl.pallas_call(
        transformer_block_kernel,
        out_shape=jax.ShapeDtypeStruct((B, S, DP), x.dtype),
        grid=grid,
        in_specs=in_specs,
        out_specs=pl.BlockSpec((tb, S, DP), lambda b: (b, 0, 0)),
        compiler_params=pltpu.CompilerParams(dimension_semantics=("parallel",)),
    )(x_p, *weights)
    return out_p[..., :DIM]


def reference(x, p):
    """Pure-JAX reference mirroring the PyTorch forward (uses the ORIGINAL params,
    independently validating the pack_params transform)."""
    def ln(t, w, b):
        mu = t.mean(-1, keepdims=True)
        var = ((t - mu) ** 2).mean(-1, keepdims=True)
        return (t - mu) / jnp.sqrt(var + EPS) * w[0] + b[0]

    B, S, D = x.shape
    x1 = ln(x, p["ln1w"], p["ln1b"])
    qkv = x1 @ p["wqkv"].T + p["bqkv"][0]
    q, k, v = jnp.split(qkv, 3, axis=-1)

    def heads(t):
        return t.reshape(B, S, HEADS, HEAD_DIM).transpose(0, 2, 1, 3)

    qh = heads(q) * (1.0 / math.sqrt(HEAD_DIM))
    kh, vh = heads(k), heads(v)
    s = jnp.einsum("bhqd,bhkd->bhqk", qh, kh)
    pmat = jax.nn.softmax(s, axis=-1)
    o = jnp.einsum("bhqk,bhkd->bhqd", pmat, vh).transpose(0, 2, 1, 3).reshape(B, S, D)
    attn = o @ p["wo"].T + p["bo"][0]
    x = x + attn
    x2 = ln(x, p["ln2w"], p["ln2b"])
    h = jax.nn.relu(x2 @ p["w1"].T + p["b1"][0])
    return x + (h @ p["w2"].T + p["b2"][0])


def make_params(key):
    ks = jax.random.split(key, 12)

    def nrm(k, shape, s=0.02):
        return jax.random.normal(k, shape, jnp.float32) * s

    return {
        "ln1w": 1.0 + nrm(ks[0], (1, DIM)),
        "ln1b": nrm(ks[1], (1, DIM)),
        "wqkv": nrm(ks[2], (3 * DIM, DIM)),
        "bqkv": nrm(ks[3], (1, 3 * DIM)),
        "wo":   nrm(ks[4], (DIM, DIM)),
        "bo":   nrm(ks[5], (1, DIM)),
        "ln2w": 1.0 + nrm(ks[6], (1, DIM)),
        "ln2b": nrm(ks[7], (1, DIM)),
        "w1":   nrm(ks[8], (MLP_HIDDEN, DIM)),
        "b1":   nrm(ks[9], (1, MLP_HIDDEN)),
        "w2":   nrm(ks[10], (DIM, MLP_HIDDEN)),
        "b2":   nrm(ks[11], (1, DIM)),
    }


if __name__ == "__main__":
    key = jax.random.PRNGKey(0)
    kx, kp = jax.random.split(key)
    B, S = 2, 8
    x = jax.random.normal(kx, (B, S, DIM), jnp.float32)
    params = make_params(kp)
    packed = pack_params(params)      # one-time parameter transform

    out = transformer_block(x, packed)
    out = jax.block_until_ready(out)

    ref = reference(x, params)
    assert out.shape == (B, S, DIM)
    assert bool(jnp.all(jnp.isfinite(out)))
    assert bool(jnp.allclose(out, ref, atol=1e-4, rtol=1e-4)), "mismatch vs reference"
    print("KERNEL_OK")
</pallas_src>

<mosaic_0001>
module attributes {stable_mosaic.version = 11 : i64} {
  func.func @transformer_block_kernel(%arg0: i32, %arg1: memref<2x8x128xf32, #tpu.memory_space<vmem>>, %arg2: memref<1x128xf32, #tpu.memory_space<vmem>>, %arg3: memref<1x128xf32, #tpu.memory_space<vmem>>, %arg4: memref<128x96xf32, #tpu.memory_space<vmem>>, %arg5: memref<1x96xf32, #tpu.memory_space<vmem>>, %arg6: memref<32x128xf32, #tpu.memory_space<vmem>>, %arg7: memref<1x128xf32, #tpu.memory_space<vmem>>, %arg8: memref<1x128xf32, #tpu.memory_space<vmem>>, %arg9: memref<1x128xf32, #tpu.memory_space<vmem>>, %arg10: memref<128x128xf32, #tpu.memory_space<vmem>>, %arg11: memref<1x128xf32, #tpu.memory_space<vmem>>, %arg12: memref<128x128xf32, #tpu.memory_space<vmem>>, %arg13: memref<1x128xf32, #tpu.memory_space<vmem>>, %arg14: memref<2x8x128xf32, #tpu.memory_space<vmem>>) attributes {dimension_semantics = [#tpu.dimension_semantics<parallel>], iteration_bounds = array<i64: 1>, scalar_prefetch = 0 : i64, scratch_operands = 0 : i64, tpu.core_type = #tpu.core_type<tc>, window_params = [{transform_indices = @transform_0, window_bounds = array<i64: 2, 8, 128>}, {pipeline_mode = #tpu.pipeline_mode<synchronous>, transform_indices = @transform_1, window_bounds = array<i64: 1, 128>}, {pipeline_mode = #tpu.pipeline_mode<synchronous>, transform_indices = @transform_2, window_bounds = array<i64: 1, 128>}, {pipeline_mode = #tpu.pipeline_mode<synchronous>, transform_indices = @transform_3, window_bounds = array<i64: 128, 96>}, {pipeline_mode = #tpu.pipeline_mode<synchronous>, transform_indices = @transform_4, window_bounds = array<i64: 1, 96>}, {pipeline_mode = #tpu.pipeline_mode<synchronous>, transform_indices = @transform_5, window_bounds = array<i64: 32, 128>}, {pipeline_mode = #tpu.pipeline_mode<synchronous>, transform_indices = @transform_6, window_bounds = array<i64: 1, 128>}, {pipeline_mode = #tpu.pipeline_mode<synchronous>, transform_indices = @transform_7, window_bounds = array<i64: 1, 128>}, {pipeline_mode = #tpu.pipeline_mode<synchronous>, transform_indices = @transform_8, window_bounds = array<i64: 1, 128>}, {pipeline_mode = #tpu.pipeline_mode<synchronous>, transform_indices = @transform_9, window_bounds = array<i64: 128, 128>}, {pipeline_mode = #tpu.pipeline_mode<synchronous>, transform_indices = @transform_10, window_bounds = array<i64: 1, 128>}, {pipeline_mode = #tpu.pipeline_mode<synchronous>, transform_indices = @transform_11, window_bounds = array<i64: 128, 128>}, {pipeline_mode = #tpu.pipeline_mode<synchronous>, transform_indices = @transform_12, window_bounds = array<i64: 1, 128>}, {transform_indices = @transform_13, window_bounds = array<i64: 2, 8, 128>}]} {
    %c0 = arith.constant 0 : index
    %c0_0 = arith.constant 0 : index
    %c0_1 = arith.constant 0 : index
    %0 = vector.load %arg1[%c0, %c0_0, %c0_1] : memref<2x8x128xf32, #tpu.memory_space<vmem>>, vector<2x8x128xf32>
    %1 = vector.shape_cast %0 : vector<2x8x128xf32> to vector<16x128xf32>
    %2 = tpu.iota {dimensions = array<i32: 1>} : vector<1x128xi32>
    %c32_i32 = arith.constant 32 : i32
    %3 = vector.broadcast %c32_i32 : i32 to vector<1x128xi32>
    %4 = arith.cmpi slt, %2, %3 : vector<1x128xi32>
    %5 = arith.extui %4 : vector<1x128xi1> to vector<1x128xi32>
    %6 = arith.sitofp %5 : vector<1x128xi32> to vector<1x128xf32>
    %c0_2 = arith.constant 0 : index
    %c0_3 = arith.constant 0 : index
    %7 = vector.load %arg2[%c0_2, %c0_3] : memref<1x128xf32, #tpu.memory_space<vmem>>, vector<1x128xf32>
    %c0_4 = arith.constant 0 : index
    %c0_5 = arith.constant 0 : index
    %8 = vector.load %arg3[%c0_4, %c0_5] : memref<1x128xf32, #tpu.memory_space<vmem>>, vector<1x128xf32>
    %cst = arith.constant dense<0.000000e+00> : vector<16xf32>
    %9 = vector.multi_reduction <add>, %1, %cst [1] : vector<16x128xf32> to vector<16xf32>
    %10 = vector.shape_cast %9 : vector<16xf32> to vector<16x1xf32>
    %cst_6 = arith.constant 3.125000e-02 : f32
    %11 = vector.broadcast %cst_6 : f32 to vector<16x1xf32>
    %12 = arith.mulf %10, %11 : vector<16x1xf32>
    %13 = vector.broadcast %12 : vector<16x1xf32> to vector<16x128xf32>
    %14 = arith.subf %1, %13 : vector<16x128xf32>
    %15 = vector.broadcast %6 : vector<1x128xf32> to vector<16x128xf32>
    %16 = arith.mulf %14, %15 : vector<16x128xf32>
    %17 = arith.mulf %16, %16 : vector<16x128xf32>
    %cst_7 = arith.constant dense<0.000000e+00> : vector<16xf32>
    %18 = vector.multi_reduction <add>, %17, %cst_7 [1] : vector<16x128xf32> to vector<16xf32>
    %19 = vector.shape_cast %18 : vector<16xf32> to vector<16x1xf32>
    %cst_8 = arith.constant 3.125000e-02 : f32
    %20 = vector.broadcast %cst_8 : f32 to vector<16x1xf32>
    %21 = arith.mulf %19, %20 : vector<16x1xf32>
    %cst_9 = arith.constant 9.99999974E-6 : f32
    %22 = vector.broadcast %cst_9 : f32 to vector<16x1xf32>
    %23 = arith.addf %21, %22 : vector<16x1xf32>
    %24 = math.rsqrt %23 : vector<16x1xf32>
    %25 = vector.broadcast %24 : vector<16x1xf32> to vector<16x128xf32>
    %26 = arith.mulf %16, %25 : vector<16x128xf32>
    %27 = vector.broadcast %7 : vector<1x128xf32> to vector<16x128xf32>
    %28 = arith.mulf %26, %27 : vector<16x128xf32>
    %29 = vector.broadcast %8 : vector<1x128xf32> to vector<16x128xf32>
    %30 = arith.addf %28, %29 : vector<16x128xf32>
    %c0_10 = arith.constant 0 : index
    %c0_11 = arith.constant 0 : index
    %31 = vector.load %arg4[%c0_10, %c0_11] : memref<128x96xf32, #tpu.memory_space<vmem>>, vector<128x96xf32>
    %cst_12 = arith.constant dense<0.000000e+00> : vector<16x96xf32>
    %32 = tpu.matmul %30, %31, %cst_12 {dimension_numbers = #tpu.dot_dimension_numbers<[1], [0], [0], [1], [0, 0, 1, 1], [], []>} : vector<16x128xf32>, vector<128x96xf32>, vector<16x96xf32> -> vector<16x96xf32>
    %c0_13 = arith.constant 0 : index
    %c0_14 = arith.constant 0 : index
    %33 = vector.load %arg5[%c0_13, %c0_14] : memref<1x96xf32, #tpu.memory_space<vmem>>, vector<1x96xf32>
    %34 = vector.broadcast %33 : vector<1x96xf32> to vector<16x96xf32>
    %35 = arith.addf %32, %34 : vector<16x96xf32>
    %36 = vector.extract_strided_slice %35 {offsets = [0, 0], sizes = [16, 32], strides = [1, 1]} : vector<16x96xf32> to vector<16x32xf32>
    %37 = vector.shape_cast %36 : vector<16x32xf32> to vector<2x8x32xf32>
    %38 = vector.extract_strided_slice %35 {offsets = [0, 32], sizes = [16, 32], strides = [1, 1]} : vector<16x96xf32> to vector<16x32xf32>
    %39 = vector.shape_cast %38 : vector<16x32xf32> to vector<2x8x32xf32>
    %40 = vector.extract_strided_slice %35 {offsets = [0, 64], sizes = [16, 32], strides = [1, 1]} : vector<16x96xf32> to vector<16x32xf32>
    %41 = vector.shape_cast %40 : vector<16x32xf32> to vector<2x8x32xf32>
    %c0_15 = arith.constant 0 : index
    %c0_16 = arith.constant 0 : index
    %42 = vector.load %arg6[%c0_15, %c0_16] : memref<32x128xf32, #tpu.memory_space<vmem>>, vector<32x128xf32>
    %cst_17 = arith.constant 0.000000e+00 : f32
    %43 = vector.broadcast %cst_17 : f32 to vector<16x128xf32>
    %44 = vector.extract_strided_slice %37 {offsets = [0, 0, 0], sizes = [2, 8, 4], strides = [1, 1, 1]} : vector<2x8x32xf32> to vector<2x8x4xf32>
    %45 = vector.extract_strided_slice %39 {offsets = [0, 0, 0], sizes = [2, 8, 4], strides = [1, 1, 1]} : vector<2x8x32xf32> to vector<2x8x4xf32>
    %46 = vector.extract_strided_slice %41 {offsets = [0, 0, 0], sizes = [2, 8, 4], strides = [1, 1, 1]} : vector<2x8x32xf32> to vector<2x8x4xf32>
    "tpu.trace_start"() <{level = 10 : i32, message = "bqd,bkd->bqk"}> : () -> ()
    %cst_18 = arith.constant dense<0.000000e+00> : vector<2x8x8xf32>
    %47 = tpu.matmul %44, %45, %cst_18 {dimension_numbers = #tpu.dot_dimension_numbers<[2], [2], [1], [1], [0, 0, 0, 1, 1, 1], [0], [0]>} : vector<2x8x4xf32>, vector<2x8x4xf32>, vector<2x8x8xf32> -> vector<2x8x8xf32>
    "tpu.trace_stop"() : () -> ()
    %cst_19 = arith.constant dense<0xFF800000> : vector<2x8xf32>
    %48 = vector.multi_reduction <maximumf>, %47, %cst_19 [2] : vector<2x8x8xf32> to vector<2x8xf32>
    %49 = vector.shape_cast %48 : vector<2x8xf32> to vector<2x8x1xf32>
    %50 = vector.broadcast %49 : vector<2x8x1xf32> to vector<2x8x8xf32>
    %51 = arith.subf %47, %50 : vector<2x8x8xf32>
    %52 = math.exp %51 : vector<2x8x8xf32>
    %cst_20 = arith.constant dense<0.000000e+00> : vector<2x8xf32>
    %53 = vector.multi_reduction <add>, %52, %cst_20 [2] : vector<2x8x8xf32> to vector<2x8xf32>
    %54 = vector.shape_cast %53 : vector<2x8xf32> to vector<2x8x1xf32>
    %55 = tpu.reciprocal %54 {approx = true} : vector<2x8x1xf32> -> vector<2x8x1xf32>
    %56 = vector.broadcast %55 : vector<2x8x1xf32> to vector<2x8x8xf32>
    %57 = arith.mulf %52, %56 : vector<2x8x8xf32>
    "tpu.trace_start"() <{level = 10 : i32, message = "bqk,bkd->bqd"}> : () -> ()
    %cst_21 = arith.constant dense<0.000000e+00> : vector<2x8x4xf32>
    %58 = tpu.matmul %57, %46, %cst_21 {dimension_numbers = #tpu.dot_dimension_numbers<[2], [1], [1], [2], [0, 0, 0, 1, 1, 2], [0], [0]>} : vector<2x8x8xf32>, vector<2x8x4xf32>, vector<2x8x4xf32> -> vector<2x8x4xf32>
    "tpu.trace_stop"() : () -> ()
    %59 = vector.shape_cast %58 : vector<2x8x4xf32> to vector<16x4xf32>
    %60 = vector.extract_strided_slice %42 {offsets = [0, 0], sizes = [4, 128], strides = [1, 1]} : vector<32x128xf32> to vector<4x128xf32>
    %cst_22 = arith.constant dense<0.000000e+00> : vector<16x128xf32>
    %61 = tpu.matmul %59, %60, %cst_22 {dimension_numbers = #tpu.dot_dimension_numbers<[1], [0], [0], [1], [0, 0, 1, 1], [], []>} : vector<16x4xf32>, vector<4x128xf32>, vector<16x128xf32> -> vector<16x128xf32>
    %62 = arith.addf %43, %61 : vector<16x128xf32>
    %63 = vector.extract_strided_slice %37 {offsets = [0, 0, 4], sizes = [2, 8, 4], strides = [1, 1, 1]} : vector<2x8x32xf32> to vector<2x8x4xf32>
    %64 = vector.extract_strided_slice %39 {offsets = [0, 0, 4], sizes = [2, 8, 4], strides = [1, 1, 1]} : vector<2x8x32xf32> to vector<2x8x4xf32>
    %65 = vector.extract_strided_slice %41 {offsets = [0, 0, 4], sizes = [2, 8, 4], strides = [1, 1, 1]} : vector<2x8x32xf32> to vector<2x8x4xf32>
    "tpu.trace_start"() <{level = 10 : i32, message = "bqd,bkd->bqk"}> : () -> ()
    %cst_23 = arith.constant dense<0.000000e+00> : vector<2x8x8xf32>
    %66 = tpu.matmul %63, %64, %cst_23 {dimension_numbers = #tpu.dot_dimension_numbers<[2], [2], [1], [1], [0, 0, 0, 1, 1, 1], [0], [0]>} : vector<2x8x4xf32>, vector<2x8x4xf32>, vector<2x8x8xf32> -> vector<2x8x8xf32>
    "tpu.trace_stop"() : () -> ()
    %cst_24 = arith.constant dense<0xFF800000> : vector<2x8xf32>
    %67 = vector.multi_reduction <maximumf>, %66, %cst_24 [2] : vector<2x8x8xf32> to vector<2x8xf32>
    %68 = vector.shape_cast %67 : vector<2x8xf32> to vector<2x8x1xf32>
    %69 = vector.broadcast %68 : vector<2x8x1xf32> to vector<2x8x8xf32>
    %70 = arith.subf %66, %69 : vector<2x8x8xf32>
    %71 = math.exp %70 : vector<2x8x8xf32>
    %cst_25 = arith.constant dense<0.000000e+00> : vector<2x8xf32>
    %72 = vector.multi_reduction <add>, %71, %cst_25 [2] : vector<2x8x8xf32> to vector<2x8xf32>
    %73 = vector.shape_cast %72 : vector<2x8xf32> to vector<2x8x1xf32>
    %74 = tpu.reciprocal %73 {approx = true} : vector<2x8x1xf32> -> vector<2x8x1xf32>
    %75 = vector.broadcast %74 : vector<2x8x1xf32> to vector<2x8x8xf32>
    %76 = arith.mulf %71, %75 : vector<2x8x8xf32>
    "tpu.trace_start"() <{level = 10 : i32, message = "bqk,bkd->bqd"}> : () -> ()
    %cst_26 = arith.constant dense<0.000000e+00> : vector<2x8x4xf32>
    %77 = tpu.matmul %76, %65, %cst_26 {dimension_numbers = #tpu.dot_dimension_numbers<[2], [1], [1], [2], [0, 0, 0, 1, 1, 2], [0], [0]>} : vector<2x8x8xf32>, vector<2x8x4xf32>, vector<2x8x4xf32> -> vector<2x8x4xf32>
    "tpu.trace_stop"() : () -> ()
    %78 = vector.shape_cast %77 : vector<2x8x4xf32> to vector<16x4xf32>
    %79 = vector.extract_strided_slice %42 {offsets = [4, 0], sizes = [4, 128], strides = [1, 1]} : vector<32x128xf32> to vector<4x128xf32>
    %cst_27 = arith.constant dense<0.000000e+00> : vector<16x128xf32>
    %80 = tpu.matmul %78, %79, %cst_27 {dimension_numbers = #tpu.dot_dimension_numbers<[1], [0], [0], [1], [0, 0, 1, 1], [], []>} : vector<16x4xf32>, vector<4x128xf32>, vector<16x128xf32> -> vector<16x128xf32>
    %81 = arith.addf %62, %80 : vector<16x128xf32>
    %82 = vector.extract_strided_slice %37 {offsets = [0, 0, 8], sizes = [2, 8, 4], strides = [1, 1, 1]} : vector<2x8x32xf32> to vector<2x8x4xf32>
    %83 = vector.extract_strided_slice %39 {offsets = [0, 0, 8], sizes = [2, 8, 4], strides = [1, 1, 1]} : vector<2x8x32xf32> to vector<2x8x4xf32>
    %84 = vector.extract_strided_slice %41 {offsets = [0, 0, 8], sizes = [2, 8, 4], strides = [1, 1, 1]} : vector<2x8x32xf32> to vector<2x8x4xf32>
    "tpu.trace_start"() <{level = 10 : i32, message = "bqd,bkd->bqk"}> : () -> ()
    %cst_28 = arith.constant dense<0.000000e+00> : vector<2x8x8xf32>
    %85 = tpu.matmul %82, %83, %cst_28 {dimension_numbers = #tpu.dot_dimension_numbers<[2], [2], [1], [1], [0, 0, 0, 1, 1, 1], [0], [0]>} : vector<2x8x4xf32>, vector<2x8x4xf32>, vector<2x8x8xf32> -> vector<2x8x8xf32>
    "tpu.trace_stop"() : () -> ()
    %cst_29 = arith.constant dense<0xFF800000> : vector<2x8xf32>
    %86 = vector.multi_reduction <maximumf>, %85, %cst_29 [2] : vector<2x8x8xf32> to vector<2x8xf32>
    %87 = vector.shape_cast %86 : vector<2x8xf32> to vector<2x8x1xf32>
    %88 = vector.broadcast %87 : vector<2x8x1xf32> to vector<2x8x8xf32>
    %89 = arith.subf %85, %88 : vector<2x8x8xf32>
    %90 = math.exp %89 : vector<2x8x8xf32>
    %cst_30 = arith.constant dense<0.000000e+00> : vector<2x8xf32>
    %91 = vector.multi_reduction <add>, %90, %cst_30 [2] : vector<2x8x8xf32> to vector<2x8xf32>
    %92 = vector.shape_cast %91 : vector<2x8xf32> to vector<2x8x1xf32>
    %93 = tpu.reciprocal %92 {approx = true} : vector<2x8x1xf32> -> vector<2x8x1xf32>
    %94 = vector.broadcast %93 : vector<2x8x1xf32> to vector<2x8x8xf32>
    %95 = arith.mulf %90, %94 : vector<2x8x8xf32>
    "tpu.trace_start"() <{level = 10 : i32, message = "bqk,bkd->bqd"}> : () -> ()
    %cst_31 = arith.constant dense<0.000000e+00> : vector<2x8x4xf32>
    %96 = tpu.matmul %95, %84, %cst_31 {dimension_numbers = #tpu.dot_dimension_numbers<[2], [1], [1], [2], [0, 0, 0, 1, 1, 2], [0], [0]>} : vector<2x8x8xf32>, vector<2x8x4xf32>, vector<2x8x4xf32> -> vector<2x8x4xf32>
    "tpu.trace_stop"() : () -> ()
    %97 = vector.shape_cast %96 : vector<2x8x4xf32> to vector<16x4xf32>
    %98 = vector.extract_strided_slice %42 {offsets = [8, 0], sizes = [4, 128], strides = [1, 1]} : vector<32x128xf32> to vector<4x128xf32>
    %cst_32 = arith.constant dense<0.000000e+00> : vector<16x128xf32>
    %99 = tpu.matmul %97, %98, %cst_32 {dimension_numbers = #tpu.dot_dimension_numbers<[1], [0], [0], [1], [0, 0, 1, 1], [], []>} : vector<16x4xf32>, vector<4x128xf32>, vector<16x128xf32> -> vector<16x128xf32>
    %100 = arith.addf %81, %99 : vector<16x128xf32>
    %101 = vector.extract_strided_slice %37 {offsets = [0, 0, 12], sizes = [2, 8, 4], strides = [1, 1, 1]} : vector<2x8x32xf32> to vector<2x8x4xf32>
    %102 = vector.extract_strided_slice %39 {offsets = [0, 0, 12], sizes = [2, 8, 4], strides = [1, 1, 1]} : vector<2x8x32xf32> to vector<2x8x4xf32>
    %103 = vector.extract_strided_slice %41 {offsets = [0, 0, 12], sizes = [2, 8, 4], strides = [1, 1, 1]} : vector<2x8x32xf32> to vector<2x8x4xf32>
    "tpu.trace_start"() <{level = 10 : i32, message = "bqd,bkd->bqk"}> : () -> ()
    %cst_33 = arith.constant dense<0.000000e+00> : vector<2x8x8xf32>
    %104 = tpu.matmul %101, %102, %cst_33 {dimension_numbers = #tpu.dot_dimension_numbers<[2], [2], [1], [1], [0, 0, 0, 1, 1, 1], [0], [0]>} : vector<2x8x4xf32>, vector<2x8x4xf32>, vector<2x8x8xf32> -> vector<2x8x8xf32>
    "tpu.trace_stop"() : () -> ()
    %cst_34 = arith.constant dense<0xFF800000> : vector<2x8xf32>
    %105 = vector.multi_reduction <maximumf>, %104, %cst_34 [2] : vector<2x8x8xf32> to vector<2x8xf32>
    %106 = vector.shape_cast %105 : vector<2x8xf32> to vector<2x8x1xf32>
    %107 = vector.broadcast %106 : vector<2x8x1xf32> to vector<2x8x8xf32>
    %108 = arith.subf %104, %107 : vector<2x8x8xf32>
    %109 = math.exp %108 : vector<2x8x8xf32>
    %cst_35 = arith.constant dense<0.000000e+00> : vector<2x8xf32>
    %110 = vector.multi_reduction <add>, %109, %cst_35 [2] : vector<2x8x8xf32> to vector<2x8xf32>
    %111 = vector.shape_cast %110 : vector<2x8xf32> to vector<2x8x1xf32>
    %112 = tpu.reciprocal %111 {approx = true} : vector<2x8x1xf32> -> vector<2x8x1xf32>
    %113 = vector.broadcast %112 : vector<2x8x1xf32> to vector<2x8x8xf32>
    %114 = arith.mulf %109, %113 : vector<2x8x8xf32>
    "tpu.trace_start"() <{level = 10 : i32, message = "bqk,bkd->bqd"}> : () -> ()
    %cst_36 = arith.constant dense<0.000000e+00> : vector<2x8x4xf32>
    %115 = tpu.matmul %114, %103, %cst_36 {dimension_numbers = #tpu.dot_dimension_numbers<[2], [1], [1], [2], [0, 0, 0, 1, 1, 2], [0], [0]>} : vector<2x8x8xf32>, vector<2x8x4xf32>, vector<2x8x4xf32> -> vector<2x8x4xf32>
    "tpu.trace_stop"() : () -> ()
    %116 = vector.shape_cast %115 : vector<2x8x4xf32> to vector<16x4xf32>
    %117 = vector.extract_strided_slice %42 {offsets = [12, 0], sizes = [4, 128], strides = [1, 1]} : vector<32x128xf32> to vector<4x128xf32>
    %cst_37 = arith.constant dense<0.000000e+00> : vector<16x128xf32>
    %118 = tpu.matmul %116, %117, %cst_37 {dimension_numbers = #tpu.dot_dimension_numbers<[1], [0], [0], [1], [0, 0, 1, 1], [], []>} : vector<16x4xf32>, vector<4x128xf32>, vector<16x128xf32> -> vector<16x128xf32>
    %119 = arith.addf %100, %118 : vector<16x128xf32>
    %120 = vector.extract_strided_slice %37 {offsets = [0, 0, 16], sizes = [2, 8, 4], strides = [1, 1, 1]} : vector<2x8x32xf32> to vector<2x8x4xf32>
    %121 = vector.extract_strided_slice %39 {offsets = [0, 0, 16], sizes = [2, 8, 4], strides = [1, 1, 1]} : vector<2x8x32xf32> to vector<2x8x4xf32>
    %122 = vector.extract_strided_slice %41 {offsets = [0, 0, 16], sizes = [2, 8, 4], strides = [1, 1, 1]} : vector<2x8x32xf32> to vector<2x8x4xf32>
    "tpu.trace_start"() <{level = 10 : i32, message = "bqd,bkd->bqk"}> : () -> ()
    %cst_38 = arith.constant dense<0.000000e+00> : vector<2x8x8xf32>
    %123 = tpu.matmul %120, %121, %cst_38 {dimension_numbers = #tpu.dot_dimension_numbers<[2], [2], [1], [1], [0, 0, 0, 1, 1, 1], [0], [0]>} : vector<2x8x4xf32>, vector<2x8x4xf32>, vector<2x8x8xf32> -> vector<2x8x8xf32>
    "tpu.trace_stop"() : () -> ()
    %cst_39 = arith.constant dense<0xFF800000> : vector<2x8xf32>
    %124 = vector.multi_reduction <maximumf>, %123, %cst_39 [2] : vector<2x8x8xf32> to vector<2x8xf32>
    %125 = vector.shape_cast %124 : vector<2x8xf32> to vector<2x8x1xf32>
    %126 = vector.broadcast %125 : vector<2x8x1xf32> to vector<2x8x8xf32>
    %127 = arith.subf %123, %126 : vector<2x8x8xf32>
    %128 = math.exp %127 : vector<2x8x8xf32>
    %cst_40 = arith.constant dense<0.000000e+00> : vector<2x8xf32>
    %129 = vector.multi_reduction <add>, %128, %cst_40 [2] : vector<2x8x8xf32> to vector<2x8xf32>
    %130 = vector.shape_cast %129 : vector<2x8xf32> to vector<2x8x1xf32>
    %131 = tpu.reciprocal %130 {approx = true} : vector<2x8x1xf32> -> vector<2x8x1xf32>
    %132 = vector.broadcast %131 : vector<2x8x1xf32> to vector<2x8x8xf32>
    %133 = arith.mulf %128, %132 : vector<2x8x8xf32>
    "tpu.trace_start"() <{level = 10 : i32, message = "bqk,bkd->bqd"}> : () -> ()
    %cst_41 = arith.constant dense<0.000000e+00> : vector<2x8x4xf32>
    %134 = tpu.matmul %133, %122, %cst_41 {dimension_numbers = #tpu.dot_dimension_numbers<[2], [1], [1], [2], [0, 0, 0, 1, 1, 2], [0], [0]>} : vector<2x8x8xf32>, vector<2x8x4xf32>, vector<2x8x4xf32> -> vector<2x8x4xf32>
    "tpu.trace_stop"() : () -> ()
    %135 = vector.shape_cast %134 : vector<2x8x4xf32> to vector<16x4xf32>
    %136 = vector.extract_strided_slice %42 {offsets = [16, 0], sizes = [4, 128], strides = [1, 1]} : vector<32x128xf32> to vector<4x128xf32>
    %cst_42 = arith.constant dense<0.000000e+00> : vector<16x128xf32>
    %137 = tpu.matmul %135, %136, %cst_42 {dimension_numbers = #tpu.dot_dimension_numbers<[1], [0], [0], [1], [0, 0, 1, 1], [], []>} : vector<16x4xf32>, vector<4x128xf32>, vector<16x128xf32> -> vector<16x128xf32>
    %138 = arith.addf %119, %137 : vector<16x128xf32>
    %139 = vector.extract_strided_slice %37 {offsets = [0, 0, 20], sizes = [2, 8, 4], strides = [1, 1, 1]} : vector<2x8x32xf32> to vector<2x8x4xf32>
    %140 = vector.extract_strided_slice %39 {offsets = [0, 0, 20], sizes = [2, 8, 4], strides = [1, 1, 1]} : vector<2x8x32xf32> to vector<2x8x4xf32>
    %141 = vector.extract_strided_slice %41 {offsets = [0, 0, 20], sizes = [2, 8, 4], strides = [1, 1, 1]} : vector<2x8x32xf32> to vector<2x8x4xf32>
    "tpu.trace_start"() <{level = 10 : i32, message = "bqd,bkd->bqk"}> : () -> ()
    %cst_43 = arith.constant dense<0.000000e+00> : vector<2x8x8xf32>
    %142 = tpu.matmul %139, %140, %cst_43 {dimension_numbers = #tpu.dot_dimension_numbers<[2], [2], [1], [1], [0, 0, 0, 1, 1, 1], [0], [0]>} : vector<2x8x4xf32>, vector<2x8x4xf32>, vector<2x8x8xf32> -> vector<2x8x8xf32>
    "tpu.trace_stop"() : () -> ()
    %cst_44 = arith.constant dense<0xFF800000> : vector<2x8xf32>
    %143 = vector.multi_reduction <maximumf>, %142, %cst_44 [2] : vector<2x8x8xf32> to vector<2x8xf32>
    %144 = vector.shape_cast %143 : vector<2x8xf32> to vector<2x8x1xf32>
    %145 = vector.broadcast %144 : vector<2x8x1xf32> to vector<2x8x8xf32>
    %146 = arith.subf %142, %145 : vector<2x8x8xf32>
    %147 = math.exp %146 : vector<2x8x8xf32>
    %cst_45 = arith.constant dense<0.000000e+00> : vector<2x8xf32>
    %148 = vector.multi_reduction <add>, %147, %cst_45 [2] : vector<2x8x8xf32> to vector<2x8xf32>
    %149 = vector.shape_cast %148 : vector<2x8xf32> to vector<2x8x1xf32>
    %150 = tpu.reciprocal %149 {approx = true} : vector<2x8x1xf32> -> vector<2x8x1xf32>
    %151 = vector.broadcast %150 : vector<2x8x1xf32> to vector<2x8x8xf32>
    %152 = arith.mulf %147, %151 : vector<2x8x8xf32>
    "tpu.trace_start"() <{level = 10 : i32, message = "bqk,bkd->bqd"}> : () -> ()
    %cst_46 = arith.constant dense<0.000000e+00> : vector<2x8x4xf32>
    %153 = tpu.matmul %152, %141, %cst_46 {dimension_numbers = #tpu.dot_dimension_numbers<[2], [1], [1], [2], [0, 0, 0, 1, 1, 2], [0], [0]>} : vector<2x8x8xf32>, vector<2x8x4xf32>, vector<2x8x4xf32> -> vector<2x8x4xf32>
    "tpu.trace_stop"() : () -> ()
    %154 = vector.shape_cast %153 : vector<2x8x4xf32> to vector<16x4xf32>
    %155 = vector.extract_strided_slice %42 {offsets = [20, 0], sizes = [4, 128], strides = [1, 1]} : vector<32x128xf32> to vector<4x128xf32>
    %cst_47 = arith.constant dense<0.000000e+00> : vector<16x128xf32>
    %156 = tpu.matmul %154, %155, %cst_47 {dimension_numbers = #tpu.dot_dimension_numbers<[1], [0], [0], [1], [0, 0, 1, 1], [], []>} : vector<16x4xf32>, vector<4x128xf32>, vector<16x128xf32> -> vector<16x128xf32>
    %157 = arith.addf %138, %156 : vector<16x128xf32>
    %158 = vector.extract_strided_slice %37 {offsets = [0, 0, 24], sizes = [2, 8, 4], strides = [1, 1, 1]} : vector<2x8x32xf32> to vector<2x8x4xf32>
    %159 = vector.extract_strided_slice %39 {offsets = [0, 0, 24], sizes = [2, 8, 4], strides = [1, 1, 1]} : vector<2x8x32xf32> to vector<2x8x4xf32>
    %160 = vector.extract_strided_slice %41 {offsets = [0, 0, 24], sizes = [2, 8, 4], strides = [1, 1, 1]} : vector<2x8x32xf32> to vector<2x8x4xf32>
    "tpu.trace_start"() <{level = 10 : i32, message = "bqd,bkd->bqk"}> : () -> ()
    %cst_48 = arith.constant dense<0.000000e+00> : vector<2x8x8xf32>
    %161 = tpu.matmul %158, %159, %cst_48 {dimension_numbers = #tpu.dot_dimension_numbers<[2], [2], [1], [1], [0, 0, 0, 1, 1, 1], [0], [0]>} : vector<2x8x4xf32>, vector<2x8x4xf32>, vector<2x8x8xf32> -> vector<2x8x8xf32>
    "tpu.trace_stop"() : () -> ()
    %cst_49 = arith.constant dense<0xFF800000> : vector<2x8xf32>
    %162 = vector.multi_reduction <maximumf>, %161, %cst_49 [2] : vector<2x8x8xf32> to vector<2x8xf32>
    %163 = vector.shape_cast %162 : vector<2x8xf32> to vector<2x8x1xf32>
    %164 = vector.broadcast %163 : vector<2x8x1xf32> to vector<2x8x8xf32>
    %165 = arith.subf %161, %164 : vector<2x8x8xf32>
    %166 = math.exp %165 : vector<2x8x8xf32>
    %cst_50 = arith.constant dense<0.000000e+00> : vector<2x8xf32>
    %167 = vector.multi_reduction <add>, %166, %cst_50 [2] : vector<2x8x8xf32> to vector<2x8xf32>
    %168 = vector.shape_cast %167 : vector<2x8xf32> to vector<2x8x1xf32>
    %169 = tpu.reciprocal %168 {approx = true} : vector<2x8x1xf32> -> vector<2x8x1xf32>
    %170 = vector.broadcast %169 : vector<2x8x1xf32> to vector<2x8x8xf32>
    %171 = arith.mulf %166, %170 : vector<2x8x8xf32>
    "tpu.trace_start"() <{level = 10 : i32, message = "bqk,bkd->bqd"}> : () -> ()
    %cst_51 = arith.constant dense<0.000000e+00> : vector<2x8x4xf32>
    %172 = tpu.matmul %171, %160, %cst_51 {dimension_numbers = #tpu.dot_dimension_numbers<[2], [1], [1], [2], [0, 0, 0, 1, 1, 2], [0], [0]>} : vector<2x8x8xf32>, vector<2x8x4xf32>, vector<2x8x4xf32> -> vector<2x8x4xf32>
    "tpu.trace_stop"() : () -> ()
    %173 = vector.shape_cast %172 : vector<2x8x4xf32> to vector<16x4xf32>
    %174 = vector.extract_strided_slice %42 {offsets = [24, 0], sizes = [4, 128], strides = [1, 1]} : vector<32x128xf32> to vector<4x128xf32>
    %cst_52 = arith.constant dense<0.000000e+00> : vector<16x128xf32>
    %175 = tpu.matmul %173, %174, %cst_52 {dimension_numbers = #tpu.dot_dimension_numbers<[1], [0], [0], [1], [0, 0, 1, 1], [], []>} : vector<16x4xf32>, vector<4x128xf32>, vector<16x128xf32> -> vector<16x128xf32>
    %176 = arith.addf %157, %175 : vector<16x128xf32>
    %177 = vector.extract_strided_slice %37 {offsets = [0, 0, 28], sizes = [2, 8, 4], strides = [1, 1, 1]} : vector<2x8x32xf32> to vector<2x8x4xf32>
    %178 = vector.extract_strided_slice %39 {offsets = [0, 0, 28], sizes = [2, 8, 4], strides = [1, 1, 1]} : vector<2x8x32xf32> to vector<2x8x4xf32>
    %179 = vector.extract_strided_slice %41 {offsets = [0, 0, 28], sizes = [2, 8, 4], strides = [1, 1, 1]} : vector<2x8x32xf32> to vector<2x8x4xf32>
    "tpu.trace_start"() <{level = 10 : i32, message = "bqd,bkd->bqk"}> : () -> ()
    %cst_53 = arith.constant dense<0.000000e+00> : vector<2x8x8xf32>
    %180 = tpu.matmul %177, %178, %cst_53 {dimension_numbers = #tpu.dot_dimension_numbers<[2], [2], [1], [1], [0, 0, 0, 1, 1, 1], [0], [0]>} : vector<2x8x4xf32>, vector<2x8x4xf32>, vector<2x8x8xf32> -> vector<2x8x8xf32>
    "tpu.trace_stop"() : () -> ()
    %cst_54 = arith.constant dense<0xFF800000> : vector<2x8xf32>
    %181 = vector.multi_reduction <maximumf>, %180, %cst_54 [2] : vector<2x8x8xf32> to vector<2x8xf32>
    %182 = vector.shape_cast %181 : vector<2x8xf32> to vector<2x8x1xf32>
    %183 = vector.broadcast %182 : vector<2x8x1xf32> to vector<2x8x8xf32>
    %184 = arith.subf %180, %183 : vector<2x8x8xf32>
    %185 = math.exp %184 : vector<2x8x8xf32>
    %cst_55 = arith.constant dense<0.000000e+00> : vector<2x8xf32>
    %186 = vector.multi_reduction <add>, %185, %cst_55 [2] : vector<2x8x8xf32> to vector<2x8xf32>
    %187 = vector.shape_cast %186 : vector<2x8xf32> to vector<2x8x1xf32>
    %188 = tpu.reciprocal %187 {approx = true} : vector<2x8x1xf32> -> vector<2x8x1xf32>
    %189 = vector.broadcast %188 : vector<2x8x1xf32> to vector<2x8x8xf32>
    %190 = arith.mulf %185, %189 : vector<2x8x8xf32>
    "tpu.trace_start"() <{level = 10 : i32, message = "bqk,bkd->bqd"}> : () -> ()
    %cst_56 = arith.constant dense<0.000000e+00> : vector<2x8x4xf32>
    %191 = tpu.matmul %190, %179, %cst_56 {dimension_numbers = #tpu.dot_dimension_numbers<[2], [1], [1], [2], [0, 0, 0, 1, 1, 2], [0], [0]>} : vector<2x8x8xf32>, vector<2x8x4xf32>, vector<2x8x4xf32> -> vector<2x8x4xf32>
    "tpu.trace_stop"() : () -> ()
    %192 = vector.shape_cast %191 : vector<2x8x4xf32> to vector<16x4xf32>
    %193 = vector.extract_strided_slice %42 {offsets = [28, 0], sizes = [4, 128], strides = [1, 1]} : vector<32x128xf32> to vector<4x128xf32>
    %cst_57 = arith.constant dense<0.000000e+00> : vector<16x128xf32>
    %194 = tpu.matmul %192, %193, %cst_57 {dimension_numbers = #tpu.dot_dimension_numbers<[1], [0], [0], [1], [0, 0, 1, 1], [], []>} : vector<16x4xf32>, vector<4x128xf32>, vector<16x128xf32> -> vector<16x128xf32>
    %195 = arith.addf %176, %194 : vector<16x128xf32>
    %c0_58 = arith.constant 0 : index
    %c0_59 = arith.constant 0 : index
    %196 = vector.load %arg7[%c0_58, %c0_59] : memref<1x128xf32, #tpu.memory_space<vmem>>, vector<1x128xf32>
    %197 = vector.broadcast %196 : vector<1x128xf32> to vector<16x128xf32>
    %198 = arith.addf %195, %197 : vector<16x128xf32>
    %199 = arith.addf %1, %198 : vector<16x128xf32>
    %c0_60 = arith.constant 0 : index
    %c0_61 = arith.constant 0 : index
    %200 = vector.load %arg8[%c0_60, %c0_61] : memref<1x128xf32, #tpu.memory_space<vmem>>, vector<1x128xf32>
    %c0_62 = arith.constant 0 : index
    %c0_63 = arith.constant 0 : index
    %201 = vector.load %arg9[%c0_62, %c0_63] : memref<1x128xf32, #tpu.memory_space<vmem>>, vector<1x128xf32>
    %cst_64 = arith.constant dense<0.000000e+00> : vector<16xf32>
    %202 = vector.multi_reduction <add>, %199, %cst_64 [1] : vector<16x128xf32> to vector<16xf32>
    %203 = vector.shape_cast %202 : vector<16xf32> to vector<16x1xf32>
    %cst_65 = arith.constant 3.125000e-02 : f32
    %204 = vector.broadcast %cst_65 : f32 to vector<16x1xf32>
    %205 = arith.mulf %203, %204 : vector<16x1xf32>
    %206 = vector.broadcast %205 : vector<16x1xf32> to vector<16x128xf32>
    %207 = arith.subf %199, %206 : vector<16x128xf32>
    %208 = vector.broadcast %6 : vector<1x128xf32> to vector<16x128xf32>
    %209 = arith.mulf %207, %208 : vector<16x128xf32>
    %210 = arith.mulf %209, %209 : vector<16x128xf32>
    %cst_66 = arith.constant dense<0.000000e+00> : vector<16xf32>
    %211 = vector.multi_reduction <add>, %210, %cst_66 [1] : vector<16x128xf32> to vector<16xf32>
    %212 = vector.shape_cast %211 : vector<16xf32> to vector<16x1xf32>
    %cst_67 = arith.constant 3.125000e-02 : f32
    %213 = vector.broadcast %cst_67 : f32 to vector<16x1xf32>
    %214 = arith.mulf %212, %213 : vector<16x1xf32>
    %cst_68 = arith.constant 9.99999974E-6 : f32
    %215 = vector.broadcast %cst_68 : f32 to vector<16x1xf32>
    %216 = arith.addf %214, %215 : vector<16x1xf32>
    %217 = math.rsqrt %216 : vector<16x1xf32>
    %218 = vector.broadcast %217 : vector<16x1xf32> to vector<16x128xf32>
    %219 = arith.mulf %209, %218 : vector<16x128xf32>
    %220 = vector.broadcast %200 : vector<1x128xf32> to vector<16x128xf32>
    %221 = arith.mulf %219, %220 : vector<16x128xf32>
    %222 = vector.broadcast %201 : vector<1x128xf32> to vector<16x128xf32>
    %223 = arith.addf %221, %222 : vector<16x128xf32>
    %c0_69 = arith.constant 0 : index
    %c0_70 = arith.constant 0 : index
    %224 = vector.load %arg10[%c0_69, %c0_70] : memref<128x128xf32, #tpu.memory_space<vmem>>, vector<128x128xf32>
    %cst_71 = arith.constant dense<0.000000e+00> : vector<16x128xf32>
    %225 = tpu.matmul %223, %224, %cst_71 {dimension_numbers = #tpu.dot_dimension_numbers<[1], [0], [0], [1], [0, 0, 1, 1], [], []>} : vector<16x128xf32>, vector<128x128xf32>, vector<16x128xf32> -> vector<16x128xf32>
    %c0_72 = arith.constant 0 : index
    %c0_73 = arith.constant 0 : index
    %226 = vector.load %arg11[%c0_72, %c0_73] : memref<1x128xf32, #tpu.memory_space<vmem>>, vector<1x128xf32>
    %227 = vector.broadcast %226 : vector<1x128xf32> to vector<16x128xf32>
    %228 = arith.addf %225, %227 : vector<16x128xf32>
    %cst_74 = arith.constant 0.000000e+00 : f32
    %229 = vector.broadcast %cst_74 : f32 to vector<16x128xf32>
    %230 = arith.maximumf %228, %229 : vector<16x128xf32>
    %c0_75 = arith.constant 0 : index
    %c0_76 = arith.constant 0 : index
    %231 = vector.load %arg12[%c0_75, %c0_76] : memref<128x128xf32, #tpu.memory_space<vmem>>, vector<128x128xf32>
    %cst_77 = arith.constant dense<0.000000e+00> : vector<16x128xf32>
    %232 = tpu.matmul %230, %231, %cst_77 {dimension_numbers = #tpu.dot_dimension_numbers<[1], [0], [0], [1], [0, 0, 1, 1], [], []>} : vector<16x128xf32>, vector<128x128xf32>, vector<16x128xf32> -> vector<16x128xf32>
    %c0_78 = arith.constant 0 : index
    %c0_79 = arith.constant 0 : index
    %233 = vector.load %arg13[%c0_78, %c0_79] : memref<1x128xf32, #tpu.memory_space<vmem>>, vector<1x128xf32>
    %234 = vector.broadcast %233 : vector<1x128xf32> to vector<16x128xf32>
    %235 = arith.addf %232, %234 : vector<16x128xf32>
    %236 = arith.addf %199, %235 : vector<16x128xf32>
    %237 = vector.shape_cast %236 : vector<16x128xf32> to vector<2x8x128xf32>
    %c0_80 = arith.constant 0 : index
    %c0_81 = arith.constant 0 : index
    %c0_82 = arith.constant 0 : index
    %238 = vector.load %arg14[%c0_80, %c0_81, %c0_82] : memref<2x8x128xf32, #tpu.memory_space<vmem>>, vector<2x8x128xf32>
    tpu.vector_store %arg14[%c0_80, %c0_81, %c0_82], %237 {strides = array<i32>} : memref<2x8x128xf32, #tpu.memory_space<vmem>>, vector<2x8x128xf32>,
    return
  }
  func.func @transform_0(%arg0: i32) -> (i32, i32, i32) {
    %c0_i32 = arith.constant 0 : i32
    %c0_i32_0 = arith.constant 0 : i32
    %c0_i32_1 = arith.constant 0 : i32
    return %arg0, %c0_i32, %c0_i32_0 : i32, i32, i32
  }
  func.func @transform_1(%arg0: i32) -> (i32, i32) {
    %c0_i32 = arith.constant 0 : i32
    %c0_i32_0 = arith.constant 0 : i32
    %c0_i32_1 = arith.constant 0 : i32
    return %c0_i32, %c0_i32_0 : i32, i32
  }
  func.func @transform_2(%arg0: i32) -> (i32, i32) {
    %c0_i32 = arith.constant 0 : i32
    %c0_i32_0 = arith.constant 0 : i32
    %c0_i32_1 = arith.constant 0 : i32
    return %c0_i32, %c0_i32_0 : i32, i32
  }
  func.func @transform_3(%arg0: i32) -> (i32, i32) {
    %c0_i32 = arith.constant 0 : i32
    %c0_i32_0 = arith.constant 0 : i32
    %c0_i32_1 = arith.constant 0 : i32
    return %c0_i32, %c0_i32_0 : i32, i32
  }
  func.func @transform_4(%arg0: i32) -> (i32, i32) {
    %c0_i32 = arith.constant 0 : i32
    %c0_i32_0 = arith.constant 0 : i32
    %c0_i32_1 = arith.constant 0 : i32
    return %c0_i32, %c0_i32_0 : i32, i32
  }
  func.func @transform_5(%arg0: i32) -> (i32, i32) {
    %c0_i32 = arith.constant 0 : i32
    %c0_i32_0 = arith.constant 0 : i32
    %c0_i32_1 = arith.constant 0 : i32
    return %c0_i32, %c0_i32_0 : i32, i32
  }
  func.func @transform_6(%arg0: i32) -> (i32, i32) {
    %c0_i32 = arith.constant 0 : i32
    %c0_i32_0 = arith.constant 0 : i32
    %c0_i32_1 = arith.constant 0 : i32
    return %c0_i32, %c0_i32_0 : i32, i32
  }
  func.func @transform_7(%arg0: i32) -> (i32, i32) {
    %c0_i32 = arith.constant 0 : i32
    %c0_i32_0 = arith.constant 0 : i32
    %c0_i32_1 = arith.constant 0 : i32
    return %c0_i32, %c0_i32_0 : i32, i32
  }
  func.func @transform_8(%arg0: i32) -> (i32, i32) {
    %c0_i32 = arith.constant 0 : i32
    %c0_i32_0 = arith.constant 0 : i32
    %c0_i32_1 = arith.constant 0 : i32
    return %c0_i32, %c0_i32_0 : i32, i32
  }
  func.func @transform_9(%arg0: i32) -> (i32, i32) {
    %c0_i32 = arith.constant 0 : i32
    %c0_i32_0 = arith.constant 0 : i32
    %c0_i32_1 = arith.constant 0 : i32
    return %c0_i32, %c0_i32_0 : i32, i32
  }
  func.func @transform_10(%arg0: i32) -> (i32, i32) {
    %c0_i32 = arith.constant 0 : i32
    %c0_i32_0 = arith.constant 0 : i32
    %c0_i32_1 = arith.constant 0 : i32
    return %c0_i32, %c0_i32_0 : i32, i32
  }
  func.func @transform_11(%arg0: i32) -> (i32, i32) {
    %c0_i32 = arith.constant 0 : i32
    %c0_i32_0 = arith.constant 0 : i32
    %c0_i32_1 = arith.constant 0 : i32
    return %c0_i32, %c0_i32_0 : i32, i32
  }
  func.func @transform_12(%arg0: i32) -> (i32, i32) {
    %c0_i32 = arith.constant 0 : i32
    %c0_i32_0 = arith.constant 0 : i32
    %c0_i32_1 = arith.constant 0 : i32
    return %c0_i32, %c0_i32_0 : i32, i32
  }
  func.func @transform_13(%arg0: i32) -> (i32, i32, i32) {
    %c0_i32 = arith.constant 0 : i32
    %c0_i32_0 = arith.constant 0 : i32
    %c0_i32_1 = arith.constant 0 : i32
    return %arg0, %c0_i32, %c0_i32_0 : i32, i32, i32
  }
}

</mosaic_0001>

<bundles_post_ra>
// kernel: tpu_custom_call.1
= control target key start
LH: loop header
LB: loop body
LE: loop exit
PB: predicated region body
PF: predicated region fallthrough
CT: control target
= control target key end

     0   :  { %18 = vsyncpa [#allocation3], 0  ;;  %s5457_s0 = inlined_call_operand.hbm [shape: f32[2,8,128], index: 0, kind: input, shape index: {}]   ;;  %s5458_s1 = inlined_call_operand.vmem [shape: f32[1,128], index: 1, kind: input, shape index: {}]   ;;  %s5459_s2 = inlined_call_operand.vmem [shape: f32[1,128], index: 2, kind: input, shape index: {}]   ;;  %s5460_s3 = inlined_call_operand.vmem [shape: f32[128,96], index: 3, kind: input, shape index: {}]   ;;  %s5461_s4 = inlined_call_operand.hbm [shape: f32[1,96], index: 4, kind: input, shape index: {}]   ;;  %s5462_s5 = inlined_call_operand.hbm [shape: f32[32,128], index: 5, kind: input, shape index: {}]   ;;  %s5463_s6 = inlined_call_operand.hbm [shape: f32[1,128], index: 6, kind: input, shape index: {}]   ;;  %s5464_s7 = inlined_call_operand.hbm [shape: f32[1,128], index: 7, kind: input, shape index: {}]   ;;  %s5465_s8 = inlined_call_operand.hbm [shape: f32[1,128], index: 8, kind: input, shape index: {}]   ;;  %s5466_s9 = inlined_call_operand.vmem [shape: f32[128,128], index: 9, kind: input, shape index: {}]   ;;  %s5467_s10 = inlined_call_operand.vmem [shape: f32[1,128], index: 10, kind: input, shape index: {}]   ;;  %s5468_s11 = inlined_call_operand.vmem [shape: f32[128,128], index: 11, kind: input, shape index: {}]   ;;  %s5469_s12 = inlined_call_operand.vmem [shape: f32[1,128], index: 12, kind: input, shape index: {}]   ;;  %s5470_s13 = inlined_call_operand.hbm [shape: f32[2,8,128], index: 13, kind: output, shape index: {}]  }
   0x1   :  { %19 = vsyncpa [#allocation6], 0 }
   0x2   :  { %20 = vsyncpa [#allocation9], 0 }
   0x3   :  { %21 = vsyncpa [#allocation12], 0 }
   0x4   :  { %22 = vsyncpa [#allocation4], 0  ;;  %s4780_s25 = smov [#allocation5]   ;;  %s4781_s27 = smov [#allocation8]  }
   0x5   :  { %s47_s26 = sshll.u32 %s4780_s25, 4  ;;  %s69_s28 = sshll.u32 %s4781_s27, 4  ;;  %s48_s26 = int_to_ptr.vmem [resolvable:$true] %s47_s26  ;;  %s70_s28 = int_to_ptr.vmem [resolvable:$true] %s69_s28 }
   0x6   :  { %s4616_s14 = scalar_lea.hbm %s5461_s4, 16 }
   0x7   :  { %p4617_p0 = scmp.ne.s32.totalorder %s5461_s4, %s4616_s14  ;;  %p4620_p1 = scmp.lt.u32.totalorder %s4616_s14, %s5461_s4 }
   0x9   :  { %p4622_p2 = pnand %p4620_p1, %p4617_p0 }
   0xb   :  { %4625 = shalt.err (!%p4622_p2)
}
   0xc   :  { %s4626_s19 = scalar_lea.vmem %s48_s26, 16  ;;  %s4630_s20 = scalar_lea.vmem %s48_s26, 32 }
   0xd   :  { %p4627_p3 = scmp.ne.s32.totalorder %s48_s26, %s4626_s19  ;;  %p4631_p4 = scmp.lt.s32.totalorder %s48_s26, %s48_s26 }
   0xe   :  { %p4632_p5 = scmp.lt.s32.totalorder %s4630_s20, %s4626_s19 }
  0x10   :  { %p4633_p6 = por %p4632_p5, %p4631_p4 }
  0x12   :  { %p4634_p7 = pnand %p4633_p6, %p4627_p3 }
  0x14   :  { %4637 = shalt.err (!%p4634_p7)
}
  0x15   :  { %50 = dma.hbm_to_vmem [thread:$0]  %s5461_s4, 16, %s48_s26, [#allocation6]  }
  0x16   :  { %s4638_s25 = scalar_lea.hbm %s5463_s6, 16 }
  0x17   :  { %p4639_p8 = scmp.ne.s32.totalorder %s5463_s6, %s4638_s25  ;;  %p4642_p9 = scmp.lt.u32.totalorder %s4638_s25, %s5463_s6 }
  0x19   :  { %p4644_p10 = pnand %p4642_p9, %p4639_p8 }
  0x1b   :  { %4647 = shalt.err (!%p4644_p10)
}
  0x1c   :  { %s4648_s15 = scalar_lea.vmem %s70_s28, 16  ;;  %s4652_s16 = scalar_lea.vmem %s70_s28, 32 }
  0x1d   :  { %p4649_p11 = scmp.ne.s32.totalorder %s70_s28, %s4648_s15  ;;  %p4653_p12 = scmp.lt.s32.totalorder %s70_s28, %s70_s28 }
  0x1e   :  { %p4654_p13 = scmp.lt.s32.totalorder %s4652_s16, %s4648_s15 }
  0x20   :  { %p4655_p0 = por %p4654_p13, %p4653_p12 }
  0x22   :  { %p4656_p1 = pnand %p4655_p0, %p4649_p11 }
  0x24   :  { %4659 = shalt.err (!%p4656_p1)
}
  0x25   :  { %72 = dma.hbm_to_vmem [thread:$0]  %s5463_s6, 16, %s70_s28, [#allocation9]  }
  0x26   :  { %s4782_s17 = smov [#allocation2]   ;;  %s4660_s21 = scalar_lea.hbm %s5457_s0, 256 }
  0x27   :  { %s28_s18 = sshll.u32 %s4782_s17, 4  ;;  %p4661_p2 = scmp.ne.s32.totalorder %s5457_s0, %s4660_s21  ;;  %s29_s18 = int_to_ptr.vmem [resolvable:$true] %s28_s18 }
  0x28   :  { %p4664_p3 = scmp.lt.u32.totalorder %s4660_s21, %s5457_s0 }
  0x2a   :  { %p4666_p4 = pnand %p4664_p3, %p4661_p2 }
  0x2c   :  { %4669 = shalt.err (!%p4666_p4)
}
  0x2d   :  { %s4670_s27 = scalar_lea.vmem %s29_s18, 256  ;;  %p4675_p6 = scmp.lt.s32.totalorder %s29_s18, %s29_s18 }
  0x2e   :  { %p4671_p5 = scmp.ne.s32.totalorder %s29_s18, %s4670_s27  ;;  %p4676_p7 = scmp.lt.s32.totalorder %s4670_s27, %s4670_s27 }
  0x30   :  { %p4677_p8 = por %p4676_p7, %p4675_p6 }
  0x32   :  { %p4678_p9 = pnand %p4677_p8, %p4671_p5 }
  0x34   :  { %4681 = shalt.err (!%p4678_p9)
}
  0x35   :  { %s4783_s6 = smov 128   ;;  %s4784_s28 = smov 8  }
  0x36   :  { %34 = dma.hbm_to_vmem [thread:$0]  %s5457_s0, 256, %s29_s18, [#allocation3], %s4783_s6, %s4783_s6, %s4784_s28  }
  0x37   :  { %s4785_s14 = smov [#allocation7]   ;;  %s4786_s16 = smov [#allocation10]  }
  0x38   :  { %s56_s15 = sshll.u32 %s4785_s14, 4  ;;  %s79_s4 = sshll.u32 %s4786_s16, 4  ;;  %s57_s15 = int_to_ptr.vmem [resolvable:$true] %s56_s15  ;;  %s80_s4 = int_to_ptr.vmem [resolvable:$true] %s79_s4 }
  0x39   :  { %s4682_s19 = scalar_lea.hbm %s5462_s5, 512 }
  0x3a   :  { %p4683_p10 = scmp.ne.s32.totalorder %s5462_s5, %s4682_s19  ;;  %p4686_p11 = scmp.lt.u32.totalorder %s4682_s19, %s5462_s5 }
  0x3c   :  { %p4688_p12 = pnand %p4686_p11, %p4683_p10 }
  0x3e   :  { %4691 = shalt.err (!%p4688_p12)
}
  0x3f   :  { %s4692_s0 = scalar_lea.vmem %s57_s15, 512  ;;  %p4697_p0 = scmp.lt.s32.totalorder %s57_s15, %s57_s15 }
  0x40   :  { %p4693_p13 = scmp.ne.s32.totalorder %s57_s15, %s4692_s0  ;;  %p4698_p1 = scmp.lt.s32.totalorder %s4692_s0, %s4692_s0 }
  0x42   :  { %p4699_p2 = por %p4698_p1, %p4697_p0 }
  0x44   :  { %p4700_p3 = pnand %p4699_p2, %p4693_p13 }
  0x46   :  { %4703 = shalt.err (!%p4700_p3)
}
  0x47   :  { %62 = dma.hbm_to_vmem [thread:$0]  %s5462_s5, 512, %s57_s15, [#allocation6], %s4783_s6, %s4783_s6, %s4784_s28  }
  0x48   :  { %s4704_s29 = scalar_lea.hbm %s5464_s7, 16 }
  0x49   :  { %p4705_p4 = scmp.ne.s32.totalorder %s5464_s7, %s4704_s29  ;;  %p4708_p5 = scmp.lt.u32.totalorder %s4704_s29, %s5464_s7 }
  0x4b   :  { %p4710_p6 = pnand %p4708_p5, %p4705_p4 }
  0x4d   :  { %4713 = shalt.err (!%p4710_p6)
}
  0x4e   :  { %s4714_s17 = scalar_lea.vmem %s80_s4, 16  ;;  %s4718_s19 = scalar_lea.vmem %s80_s4, 32 }
  0x4f   :  { %p4715_p7 = scmp.ne.s32.totalorder %s80_s4, %s4714_s17  ;;  %p4719_p8 = scmp.lt.s32.totalorder %s80_s4, %s80_s4 }
  0x50   :  { %p4720_p9 = scmp.lt.s32.totalorder %s4718_s19, %s4714_s17 }
  0x52   :  { %p4721_p10 = por %p4720_p9, %p4719_p8 }
  0x54   :  { %p4722_p11 = pnand %p4721_p10, %p4715_p7 }
  0x56   :  { %4725 = shalt.err (!%p4722_p11)
}
  0x57   :  { %82 = dma.hbm_to_vmem [thread:$0]  %s5464_s7, 16, %s80_s4, [#allocation9]  }
  0x58   :  { %s4787_s20 = smov [#allocation11]   ;;  %s4726_s0 = scalar_lea.hbm %s5465_s8, 16 }
  0x59   :  { %s89_s21 = sshll.u32 %s4787_s20, 4  ;;  %p4727_p12 = scmp.ne.s32.totalorder %s5465_s8, %s4726_s0  ;;  %s90_s21 = int_to_ptr.vmem [resolvable:$true] %s89_s21 }
  0x5a   :  { %p4730_p13 = scmp.lt.u32.totalorder %s4726_s0, %s5465_s8 }
  0x5c   :  { %p4732_p0 = pnand %p4730_p13, %p4727_p12 }
  0x5e   :  { %4735 = shalt.err (!%p4732_p0)
}
  0x5f   :  { %s4736_s29 = scalar_lea.vmem %s90_s21, 16  ;;  %s4740_s7 = scalar_lea.vmem %s90_s21, 32 }
  0x60   :  { %p4737_p1 = scmp.ne.s32.totalorder %s90_s21, %s4736_s29  ;;  %p4741_p2 = scmp.lt.s32.totalorder %s90_s21, %s90_s21 }
  0x61   :  { %p4742_p3 = scmp.lt.s32.totalorder %s4740_s7, %s4736_s29 }
  0x63   :  { %p4743_p4 = por %p4742_p3, %p4741_p2 }
  0x65   :  { %p4744_p5 = pnand %p4743_p4, %p4737_p1 }
  0x67   :  { %4747 = shalt.err (!%p4744_p5)
}
  0x68   :  { %92 = dma.hbm_to_vmem [thread:$0]  %s5465_s8, 16, %s90_s21, [#allocation12]  }
  0x69   :  { %4770 = dma.done.wait [#allocation3], 256  }
  0x6a   :  { %4771 = vsyncadd [#allocation3], 4294967040 }
  0x6b   :  { %4772 = dma.done.wait [#allocation6], 528  }
  0x6c   :  { %4773 = vsyncadd [#allocation6], 4294966768 }
  0x6d   :  { %4774 = dma.done.wait [#allocation9], 32  }
  0x6e   :  { %4775 = vsyncadd [#allocation9], 4294967264 }
  0x6f   :  { %4776 = dma.done.wait [#allocation12], 16  }
  0x70   :  { %4777 = vsyncadd [#allocation12], 4294967280  ;;  %v119_v0 = vld [vmem:[#allocation2] sm:$0xff]  ;;  %v120_v1 = vld [vmem:[#allocation2 + $0x8] sm:$0xff]  ;;  %v4788_v2 = vmov 0.0   ;;  %v121_v9 = vlaneseq  ;;  %vm4789_vm1 = vmmov 0  }
  0x71   :  { %128 = vadd.xlane.f32.xlu0 %v119_v0  ;;  %4128 = vmatprep.subr.mxu1 %v4788_v2  ;;  %v168_v3 = vld [vmem:[%s5460_s3] sm:$0xff]  ;;  %v169_v4 = vld [vmem:[%s5460_s3 + $0x8] sm:$0xff]  ;;  %v170_v5 = vld [vmem:[%s5460_s3 + $0x10] sm:$0xff]  ;;  %vm273_vm2 = vcmask 31744   ;;  %vm425_vm3 = vcmask 64512   ;;  %s4792_s24 = smov 92  }
  0x72   :  { %v4398_v6 = vpack.c.bf16 %v169_v4, %v168_v3  ;;  %v171_v7 = vld [vmem:[%s5460_s3 + $0x18] sm:$0xff]  ;;  %v122_v10 = vand.u32 127, %v121_v9  ;;  %v172_v22 = vld [vmem:[%s5460_s3 + $0x20] sm:$0xff]  ;;  %v173_v23 = vld [vmem:[%s5460_s3 + $0x28] sm:$0xff]  ;;  %4130 = vmatprep.mubr.msk.f32.mxu1 %vm4789_vm1, %v4788_v2  ;;  %s4793_s25 = smov 124   ;;  %vm938_vm4 = vcmask 1043456  }
  0x73   :  { %v4402_v8 = vpack.c.bf16 %v171_v7, %v170_v5  ;;  %v4406_v24 = vpack.c.bf16 %v173_v23, %v172_v22  ;;  %v174_v25 = vld [vmem:[%s5460_s3 + $0x30] sm:$0xff]  ;;  %v175_v26 = vld [vmem:[%s5460_s3 + $0x38] sm:$0xff]  ;;  %v176_v28 = vld [vmem:[%s5460_s3 + $0x40] sm:$0xff]  ;;  %s4794_s27 = smov 60   ;;  %s4795_s29 = smov 88  }
  0x74   :  { %4399 = vmatprep.subr.bf16.mxu0 %v4398_v6  ;;  %vm123_vm0 = vcmp.lt.s32.totalorder %v122_v10, 32  ;;  %v4410_v27 = vpack.c.bf16 %v175_v26, %v174_v25  ;;  %v177_v29 = vld [vmem:[%s5460_s3 + $0x48] sm:$0xff]  ;;  %v178_v31 = vld [vmem:[%s5460_s3 + $0x50] sm:$0xff]  ;;  %v179_v32 = vld [vmem:[%s5460_s3 + $0x58] sm:$0xff]  ;;  %s4796_s7 = smov 120   ;;  %s4797_s4 = smov 56  }
  0x75   :  { %130 = vadd.xlane.f32.xlu0 %v120_v1  ;;  %4401 = vmatpush3.bf16.msra.mxu0 %v4398_v6  ;;  %v4976_v13 = vsel %vm123_vm0, 1.0, %v4788_v2  ;;  %v4414_v30 = vpack.c.bf16 %v177_v29, %v176_v28  ;;  %v180_v33 = vld [vmem:[%s5460_s3 + $0x60] sm:$0xff]  ;;  %v4418_v34 = vpack.c.bf16 %v179_v32, %v178_v31  ;;  %v181_v35 = vld [vmem:[%s5460_s3 + $0x68] sm:$0xff]  ;;  %v182_v37 = vld [vmem:[%s5460_s3 + $0x70] sm:$0xff]  ;;  %s4798_s30 = smov 84   ;;  %s4799_s14 = smov 116  }
  0x76   :  { %4403 = vmatprep.subr.bf16.mxu0 %v4402_v8  ;;  %v4422_v36 = vpack.c.bf16 %v181_v35, %v180_v33  ;;  %v183_v38 = vld [vmem:[%s5460_s3 + $0x78] sm:$0xff]  ;;  %v3871_v47 = vld [vmem:[%s5458_s1] ss:$0 sm:$0xff]  ;;  %v3873_v56 = vld [vmem:[#allocation5] ss:$0 sm:$0xff]  ;;  %s4790_s1 = smov 96  }
  0x77   :  { %v4426_v39 = vpack.c.bf16 %v183_v38, %v182_v37  ;;  %v3872_v49 = vld [vmem:[%s5459_s2] ss:$0 sm:$0xff]  ;;  %s4791_s2 = smov 64   ;;  %v266_v29 = vld [vmem:[#allocation7] sm:$0xff]  ;;  %s4800_s16 = smov 80  }
  0x78   :  { %s4801_s8 = smov 52   ;;  %s4802_s26 = smov 112  }
  0x79   :  { %4405 = vmatpush3.bf16.msra.mxu0 %v4402_v8  ;;  %s4803_s17 = smov 48   ;;  %s4804_s19 = smov 76  }
  0x7a   :  { %4407 = vmatprep.subr.bf16.mxu0 %v4406_v24  ;;  %s4805_s5 = smov 108   ;;  %s4806_s15 = smov 72  }
  0x7b   :  { %s4807_s20 = smov 44   ;;  %s4808_s21 = smov 104  }
  0x7c   :  { %s4809_s22 = smov 40   ;;  %s4810_s23 = smov 68  }
  0x7d   :  { %4409 = vmatpush3.bf16.msra.mxu0 %v4406_v24  ;;  %s4811_s0 = smov 100   ;;  %s4812_s3 = smov 36  }
  0x7e   :  { %4411 = vmatprep.subr.bf16.mxu0 %v4410_v27 }
  0x81   :  { %4413 = vmatpush3.bf16.msra.mxu0 %v4410_v27 }
  0x82   :  { %4415 = vmatprep.subr.bf16.mxu0 %v4414_v30 }
  0x85   :  { %4417 = vmatpush3.bf16.msra.mxu0 %v4414_v30 }
  0x86   :  { %4419 = vmatprep.subr.bf16.mxu0 %v4418_v34 }
  0x89   :  { %4421 = vmatpush3.bf16.msra.mxu0 %v4418_v34 }
  0x8a   :  { %4423 = vmatprep.subr.bf16.mxu0 %v4422_v36 }
  0x8d   :  { %4425 = vmatpush3.bf16.msra.mxu0 %v4422_v36 }
  0x8e   :  { %4427 = vmatprep.subr.bf16.mxu0 %v4426_v39 }
  0x91   :  { %4429 = vmatpush3.bf16.msra.mxu0 %v4426_v39 }
  0x92   :  { %4173 = vmatprep.subr.msk.mxu0 %vm938_vm4, %v266_v29 }
  0xfe   :  { %v129_v11 = vpop.xlane.xlu0 %128 }
  0xff   :  { %v132_v12 = vmul.f32 0.03125, %v129_v11 }
 0x101   :  { %v134_v14 = vsub.f32 %v119_v0, %v132_v12 }
 0x102   :  { %v131_v15 = vpop.xlane.xlu0 %130 }
 0x103   :  { %v133_v16 = vmul.f32 0.03125, %v131_v15  ;;  %v136_v17 = vmul.f32 %v4976_v13, %v134_v14 }
 0x105   :  { %v135_v18 = vsub.f32 %v120_v1, %v133_v16  ;;  %v138_v19 = vmul.f32 %v136_v17, %v136_v17 }
 0x107   :  { %140 = vadd.xlane.f32.xlu1 %v138_v19  ;;  %v137_v20 = vmul.f32 %v4976_v13, %v135_v18 }
 0x109   :  { %v139_v21 = vmul.f32 %v137_v20, %v137_v20 }
 0x10b   :  { %142 = vadd.xlane.f32.xlu1 %v139_v21 }
 0x194   :  { %v141_v40 = vpop.xlane.xlu1 %140 }
 0x195   :  { %v144_v41 = vmul.f32 0.03125, %v141_v40 }
 0x197   :  { %v146_v42 = vadd.f32 1e-05, %v144_v41 }
 0x198   :  { %v143_v43 = vpop.xlane.xlu1 %142 }
 0x199   :  { %4542 = vrsqrt.f32 %v146_v42  ;;  %v145_v44 = vmul.f32 0.03125, %v143_v43 }
 0x19b   :  { %v147_v45 = vadd.f32 1e-05, %v145_v44 }
 0x19d   :  { %4544 = vrsqrt.f32 %v147_v45 }
 0x1a3   :  { %v4543_v46 = vpop.eup %4542 }
 0x1a4   :  { %v150_v48 = vmul.f32 %v4543_v46, %v136_v17 }
 0x1a6   :  { %v158_v50 = vmul.f32 %v3871_v47, %v150_v48 }
 0x1a7   :  { %v4545_v51 = vpop.eup %4544 }
 0x1a8   :  { %v151_v52 = vmul.f32 %v4545_v51, %v137_v20  ;;  %v166_v53 = vadd.f32 %v3872_v49, %v158_v50 }
 0x1aa   :  { %v159_v54 = vmul.f32 %v3871_v47, %v151_v52  ;;  %4125 = vmatprep.mubr.f32.mxu0 %v166_v53 }
 0x1ac   :  { %v167_v55 = vadd.f32 %v3872_v49, %v159_v54  ;;  %v931_v54 = vrot.slane %v266_v29, 4 }
 0x1ae   :  { %4126 = vmatmul.mubr.f32.vlgmr.msra.gmra.mrb[0].mxu0 %v167_v55 }
 0x1af   :  { %4174 = vmatpush3.msk.msra.mxu0 %vm938_vm4, %v266_v29 }
 0x1b0   :  { %4188 = vmatprep.subr.mxu0 %v4788_v2 }
 0x281   :  { %v4127_v57 = vpop.f32.mrb[0].mxu0 }
 0x282   :  { %v5024_v58 = vadd.f32 %v4127_v57, %v3873_v56  ;;  %v257_v59 = vpop.f32.mrb[1].mxu0 }
 0x283   :  { %v5026_v60 = vadd.f32 %v3873_v56, %v257_v59 }
 0x284   :  { %349 = vrot.lane.b32.xlu1 %v5024_v58, %s4790_s1 }
 0x285   :  { %271 = vrot.lane.b32.xlu0 %v5026_v60, %s4790_s1 }
 0x2f6   :  { %v350_v62 = vpop.permute.xlu1 %349 }
 0x2f7   :  { %v272_v61 = vpop.permute.xlu0 %271 }
 0x2f8   :  { %4129 = vmatpush3.xpose.msk.msra.mxu1 %vm273_vm2, %v272_v61 }
 0x2f9   :  { %4133 = vmatprep.subr.mxu1 %v4788_v2 }
 0x2fb   :  { %4131 = vmatmul.mubr.msk.f32.vlgmr.msra.gmra.mrb[0].mxu1 %vm273_vm2, %v5026_v60 }
 0x2fc   :  { %4134 = vmatpush3.xpose.msk.msra.mxu1 %vm273_vm2, %v350_v62  ;;  %4135 = vmatprep.mubr.msk.f32.mxu1 %vm4789_vm1, %v4788_v2 }
 0x2fd   :  { %4138 = vmatprep.subr.mxu1 %v4788_v2 }
 0x2ff   :  { %4136 = vmatmul.mubr.msk.f32.vlgmr.msra.gmra.mrb[2].mxu1 %vm273_vm2, %v5024_v58 }
 0x300   :  { %4140 = vmatprep.mubr.msk.f32.mxu1 %vm4789_vm1, %v4788_v2 }
 0x3ce   :  { %v344_v63 = vpop.f32.mrb[0].mxu1 }
 0x3cf   :  { %v4132_v0 = vpop.f32.mrb[1].mxu1  ;;  %v426_v1 = vsel %vm425_vm3, %v344_v63, -inf }
 0x3d0   :  { %427 = vmax.xlane.f32.xlu1 %v426_v1 }
 0x3d2   :  { %v421_v3 = vpop.f32.mrb[2].mxu1 }
 0x3d3   :  { %v4137_v4 = vpop.f32.mrb[3].mxu1  ;;  %v429_v5 = vsel %vm425_vm3, %v421_v3, -inf }
 0x3d4   :  { %430 = vmax.xlane.f32.xlu0 %v429_v5 }
 0x3e1   :  { %524 = vrot.lane.b32.xlu1 %v5024_v58, %s4791_s2 }
 0x3e5   :  { %602 = vrot.lane.b32.xlu1 %v5026_v60, %s4792_s24 }
 0x3e9   :  { %600 = vrot.lane.b32.xlu1 %v5026_v60, %s4793_s25 }
 0x45d   :  { %v428_v6 = vpop.xlane.xlu1 %427 }
 0x45e   :  { %v432_v7 = vsub.f32 %v344_v63, %v428_v6 }
 0x460   :  { %v434_v8 = vmul.f32 1.442695, %v432_v7 }
 0x461   :  { %v431_v9 = vpop.xlane.xlu0 %430  ;;  %v525_v17 = vpop.permute.xlu1 %524 }
 0x462   :  { %4546 = vpow2.f32 %v434_v8  ;;  %v433_v10 = vsub.f32 %v421_v3, %v431_v9 }
 0x464   :  { %v436_v11 = vmul.f32 1.442695, %v433_v10 }
 0x465   :  { %v603_v18 = vpop.permute.xlu1 %602 }
 0x466   :  { %4548 = vpow2.f32 %v436_v11 }
 0x469   :  { %v601_v19 = vpop.permute.xlu1 %600 }
 0x46c   :  { %v4547_v12 = vpop.eup %4546 }
 0x46d   :  { %v438_v14 = vsel %vm425_vm3, %v4547_v12, 0.0 }
 0x46e   :  { %439 = vadd.xlane.f32.xlu0 %v438_v14 }
 0x470   :  { %v4549_v15 = vpop.eup %4548 }
 0x471   :  { %v441_v16 = vsel %vm425_vm3, %v4549_v15, 0.0 }
 0x472   :  { %442 = vadd.xlane.f32.xlu1 %v441_v16 }
 0x483   :  { %678 = vrot.lane.b32.xlu1 %v5024_v58, %s4793_s25 }
 0x484   :  { %448 = vrot.lane.b32.xlu0 %v5026_v60, %s4791_s2 }
 0x488   :  { %680 = vrot.lane.b32.xlu0 %v5024_v58, %s4792_s24 }
 0x4fb   :  { %v440_v20 = vpop.xlane.xlu0 %439 }
 0x4fc   :  { %4550 = vrcp.f32 %v440_v20 }
 0x4ff   :  { %v443_v21 = vpop.xlane.xlu1 %442  ;;  %v449_v22 = vpop.permute.xlu0 %448 }
 0x500   :  { %4552 = vrcp.f32 %v443_v21  ;;  %4139 = vmatpush3.msra.mxu1 %v449_v22 }
 0x501   :  { %4143 = vmatprep.subr.mxu1 %v4788_v2 }
 0x503   :  { %v681_v27 = vpop.permute.xlu0 %680  ;;  %v679_v28 = vpop.permute.xlu1 %678 }
 0x506   :  { %v4551_v23 = vpop.eup %4550 }
 0x507   :  { %v446_v24 = vmul.f32 %v4551_v23, %v4547_v12 }
 0x509   :  { %4141 = vmatmul.mubr.msk.f32.vlgmr.msra.gmra.mrb[4].mxu1 %vm425_vm3, %v446_v24 }
 0x50a   :  { %v4553_v25 = vpop.eup %4552  ;;  %4144 = vmatpush3.msra.mxu1 %v525_v17  ;;  %4145 = vmatprep.mubr.msk.f32.mxu1 %vm4789_vm1, %v4788_v2 }
 0x50b   :  { %v447_v26 = vmul.f32 %v4553_v25, %v4549_v15  ;;  %4148 = vmatprep.subr.mxu1 %v4788_v2 }
 0x50d   :  { %4146 = vmatmul.mubr.msk.f32.vlgmr.msra.gmra.mrb[6].mxu1 %vm425_vm3, %v447_v26 }
 0x50e   :  { %4150 = vmatprep.mubr.msk.f32.mxu1 %vm4789_vm1, %v4788_v2 }
 0x511   :  { %4149 = vmatpush3.xpose.msk.msra.mxu1 %vm273_vm2, %v603_v18 }
 0x512   :  { %4153 = vmatprep.subr.mxu1 %v4788_v2 }
 0x514   :  { %4151 = vmatmul.mubr.msk.f32.vlgmr.msra.gmra.mrb[8].mxu1 %vm273_vm2, %v601_v19 }
 0x515   :  { %4154 = vmatpush3.xpose.msk.msra.mxu1 %vm273_vm2, %v681_v27  ;;  %4155 = vmatprep.mubr.msk.f32.mxu1 %vm4789_vm1, %v4788_v2 }
 0x516   :  { %4158 = vmatprep.subr.mxu1 %v4788_v2 }
 0x518   :  { %4156 = vmatmul.mubr.msk.f32.vlgmr.msra.gmra.mrb[10].mxu1 %vm273_vm2, %v679_v28  ;;  %v5126_v28 = vld [vmem:[#allocation7 + $0x8] sm:$0xff] }
 0x519   :  { %4160 = vmatprep.mubr.msk.f32.mxu1 %vm4789_vm1, %v4788_v2 }
 0x5dc   :  { %v520_v30 = vpop.f32.mrb[4].mxu1 }
 0x5dd   :  { %v4142_v31 = vpop.f32.mrb[5].mxu1  ;;  %4175 = vmatprep.mubr.msk.f32.mxu0 %vm273_vm2, %v520_v30 }
 0x5e0   :  { %v596_v32 = vpop.f32.mrb[6].mxu1 }
 0x5e1   :  { %v4147_v33 = vpop.f32.mrb[7].mxu1  ;;  %4176 = vmatmul.mubr.msk.f32.vlgmr.msra.gmra.mrb[2].mxu0 %vm273_vm2, %v596_v32 }
 0x5e2   :  { %4190 = vmatprep.mubr.msk.f32.mxu0 %vm4789_vm1, %v4788_v2 }
 0x5e7   :  { %v674_v34 = vpop.f32.mrb[8].mxu1 }
 0x5e8   :  { %v4152_v35 = vpop.f32.mrb[9].mxu1  ;;  %v756_v36 = vsel %vm425_vm3, %v674_v34, -inf }
 0x5e9   :  { %757 = vmax.xlane.f32.xlu0 %v756_v36 }
 0x5eb   :  { %v752_v37 = vpop.f32.mrb[10].mxu1 }
 0x5ec   :  { %v4157_v38 = vpop.f32.mrb[11].mxu1  ;;  %v759_v39 = vsel %vm425_vm3, %v752_v37, -inf }
 0x5ed   :  { %760 = vmax.xlane.f32.xlu1 %v759_v39 }
 0x5fe   :  { %854 = vrot.lane.b32.xlu1 %v5024_v58, %s4794_s27 }
 0x602   :  { %1101 = vrot.lane.b32.xlu1 %v5026_v60, %s4795_s29 }
 0x606   :  { %1099 = vrot.lane.b32.xlu1 %v5026_v60, %s4796_s7 }
 0x60a   :  { %1177 = vrot.lane.b32.xlu1 %v5024_v58, %s4796_s7 }
 0x676   :  { %v758_v40 = vpop.xlane.xlu0 %757 }
 0x677   :  { %v762_v41 = vsub.f32 %v674_v34, %v758_v40 }
 0x679   :  { %v764_v42 = vmul.f32 1.442695, %v762_v41 }
 0x67a   :  { %v761_v43 = vpop.xlane.xlu1 %760 }
 0x67b   :  { %4554 = vpow2.f32 %v764_v42  ;;  %v763_v44 = vsub.f32 %v752_v37, %v761_v43 }
 0x67d   :  { %v766_v45 = vmul.f32 1.442695, %v763_v44 }
 0x67e   :  { %v855_v56 = vpop.permute.xlu1 %854 }
 0x67f   :  { %4556 = vpow2.f32 %v766_v45 }
 0x682   :  { %v1102_v61 = vpop.permute.xlu1 %1101 }
 0x685   :  { %v4555_v46 = vpop.eup %4554 }
 0x686   :  { %v768_v47 = vsel %vm425_vm3, %v4555_v46, 0.0  ;;  %v1100_v3 = vpop.permute.xlu1 %1099 }
 0x687   :  { %769 = vadd.xlane.f32.xlu0 %v768_v47 }
 0x689   :  { %v4557_v48 = vpop.eup %4556 }
 0x68a   :  { %v771_v49 = vsel %vm425_vm3, %v4557_v48, 0.0  ;;  %v1178_v5 = vpop.permute.xlu1 %1177 }
 0x68b   :  { %772 = vadd.xlane.f32.xlu0 %v771_v49 }
 0x6a1   :  { %778 = vrot.lane.b32.xlu0 %v5026_v60, %s4794_s27 }
 0x6a5   :  { %1179 = vrot.lane.b32.xlu0 %v5024_v58, %s4795_s29 }
 0x714   :  { %v770_v50 = vpop.xlane.xlu0 %769 }
 0x715   :  { %4558 = vrcp.f32 %v770_v50 }
 0x718   :  { %v773_v51 = vpop.xlane.xlu0 %772 }
 0x719   :  { %4560 = vrcp.f32 %v773_v51 }
 0x71c   :  { %v779_v52 = vpop.permute.xlu0 %778 }
 0x71d   :  { %4159 = vmatpush3.msra.mxu1 %v779_v52 }
 0x71e   :  { %4163 = vmatprep.subr.mxu1 %v4788_v2 }
 0x71f   :  { %v4559_v53 = vpop.eup %4558 }
 0x720   :  { %v776_v55 = vmul.f32 %v4559_v53, %v4555_v46  ;;  %v1180_v4 = vpop.permute.xlu0 %1179 }
 0x722   :  { %4161 = vmatmul.mubr.msk.f32.vlgmr.msra.gmra.mrb[12].mxu1 %vm425_vm3, %v776_v55 }
 0x723   :  { %v4561_v57 = vpop.eup %4560  ;;  %4164 = vmatpush3.msra.mxu1 %v855_v56  ;;  %4165 = vmatprep.mubr.msk.f32.mxu1 %vm4789_vm1, %v4788_v2 }
 0x724   :  { %v777_v59 = vmul.f32 %v4561_v57, %v4557_v48  ;;  %4168 = vmatprep.subr.msk.mxu1 %vm938_vm4, %v931_v54 }
 0x726   :  { %4166 = vmatmul.mubr.msk.f32.vlgmr.msra.gmra.mrb[14].mxu1 %vm425_vm3, %v777_v59 }
 0x727   :  { %4169 = vmatpush3.msk.msra.mxu1 %vm938_vm4, %v931_v54 }
 0x728   :  { %4178 = vmatprep.subr.mxu1 %v4788_v2 }
 0x7f5   :  { %v850_v62 = vpop.f32.mrb[12].mxu1 }
 0x7f6   :  { %v4162_v63 = vpop.f32.mrb[13].mxu1  ;;  %4170 = vmatprep.mubr.msk.f32.mxu1 %vm273_vm2, %v850_v62 }
 0x7f9   :  { %v926_v0 = vpop.f32.mrb[14].mxu1 }
 0x7fa   :  { %v4167_v1 = vpop.f32.mrb[15].mxu1  ;;  %4171 = vmatmul.mubr.msk.f32.vlgmr.msra.gmra.mrb[16].mxu1 %vm273_vm2, %v926_v0 }
 0x7fb   :  { %4179 = vmatpush3.xpose.msk.msra.mxu1 %vm273_vm2, %v1102_v61  ;;  %4180 = vmatprep.mubr.msk.f32.mxu1 %vm4789_vm1, %v4788_v2 }
 0x7fc   :  { %4183 = vmatprep.subr.mxu1 %v4788_v2 }
 0x7fe   :  { %4181 = vmatmul.mubr.msk.f32.vlgmr.msra.gmra.mrb[18].mxu1 %vm273_vm2, %v1100_v3 }
 0x7ff   :  { %4184 = vmatpush3.xpose.msk.msra.mxu1 %vm273_vm2, %v1180_v4  ;;  %4185 = vmatprep.mubr.msk.f32.mxu1 %vm4789_vm1, %v4788_v2 }
 0x800   :  { %4193 = vmatprep.subr.mxu1 %v4788_v2 }
 0x802   :  { %4186 = vmatmul.mubr.msk.f32.vlgmr.msra.gmra.mrb[20].mxu1 %vm273_vm2, %v1178_v5 }
 0x803   :  { %4195 = vmatprep.mubr.msk.f32.mxu1 %vm4789_vm1, %v4788_v2 }
 0x8cd   :  { %v5109_v6 = vpop.f32.mrb[16].mxu1 }
 0x8ce   :  { %v5111_v7 = vpop.f32.mrb[17].mxu1 }
 0x8d1   :  { %v1173_v8 = vpop.f32.mrb[18].mxu1 }
 0x8d2   :  { %v4182_v9 = vpop.f32.mrb[19].mxu1  ;;  %v1255_v10 = vsel %vm425_vm3, %v1173_v8, -inf }
 0x8d3   :  { %1256 = vmax.xlane.f32.xlu0 %v1255_v10 }
 0x8d5   :  { %v1251_v11 = vpop.f32.mrb[20].mxu1 }
 0x8d6   :  { %v4187_v12 = vpop.f32.mrb[21].mxu1  ;;  %v1258_v14 = vsel %vm425_vm3, %v1251_v11, -inf }
 0x8d7   :  { %1259 = vmax.xlane.f32.xlu1 %v1258_v14 }
 0x8e8   :  { %1353 = vrot.lane.b32.xlu1 %v5024_v58, %s4797_s4 }
 0x8ec   :  { %1517 = vrot.lane.b32.xlu1 %v5026_v60, %s4798_s30 }
 0x8f0   :  { %1515 = vrot.lane.b32.xlu1 %v5026_v60, %s4799_s14 }
 0x8f4   :  { %1593 = vrot.lane.b32.xlu1 %v5024_v58, %s4799_s14 }
 0x8f8   :  { %1933 = vrot.lane.b32.xlu1 %v5026_v60, %s4800_s16 }
 0x960   :  { %v1257_v15 = vpop.xlane.xlu0 %1256 }
 0x961   :  { %v1261_v16 = vsub.f32 %v1173_v8, %v1257_v15  ;;  %v1845_v8 = vrot.slane %v5126_v28, 4 }
 0x963   :  { %v1263_v17 = vmul.f32 1.442695, %v1261_v16 }
 0x964   :  { %v1260_v18 = vpop.xlane.xlu1 %1259 }
 0x965   :  { %4562 = vpow2.f32 %v1263_v17  ;;  %v1262_v19 = vsub.f32 %v1251_v11, %v1260_v18 }
 0x967   :  { %v1265_v20 = vmul.f32 1.442695, %v1262_v19 }
 0x968   :  { %v1354_v21 = vpop.permute.xlu1 %1353 }
 0x969   :  { %4564 = vpow2.f32 %v1265_v20  ;;  %4194 = vmatpush3.msra.mxu1 %v1354_v21 }
 0x96a   :  { %4203 = vmatprep.subr.mxu1 %v4788_v2 }
 0x96c   :  { %v1518_v33 = vpop.permute.xlu1 %1517 }
 0x96f   :  { %v4563_v22 = vpop.eup %4562 }
 0x970   :  { %v1267_v23 = vsel %vm425_vm3, %v4563_v22, 0.0  ;;  %v1516_v35 = vpop.permute.xlu1 %1515 }
 0x971   :  { %1268 = vadd.xlane.f32.xlu0 %v1267_v23 }
 0x973   :  { %v4565_v24 = vpop.eup %4564 }
 0x974   :  { %v1270_v25 = vsel %vm425_vm3, %v4565_v24, 0.0  ;;  %v1594_v41 = vpop.permute.xlu1 %1593 }
 0x975   :  { %1271 = vadd.xlane.f32.xlu0 %v1270_v25 }
 0x978   :  { %v1934_v54 = vpop.permute.xlu1 %1933 }
 0x98b   :  { %1277 = vrot.lane.b32.xlu0 %v5026_v60, %s4797_s4 }
 0x98f   :  { %1595 = vrot.lane.b32.xlu0 %v5024_v58, %s4798_s30 }
 0x9fe   :  { %v1269_v26 = vpop.xlane.xlu0 %1268 }
 0x9ff   :  { %4566 = vrcp.f32 %v1269_v26 }
 0xa02   :  { %v1272_v27 = vpop.xlane.xlu0 %1271 }
 0xa03   :  { %4568 = vrcp.f32 %v1272_v27 }
 0xa06   :  { %v1278_v29 = vpop.permute.xlu0 %1277 }
 0xa07   :  { %4189 = vmatpush3.msra.mxu0 %v1278_v29 }
 0xa08   :  { %4198 = vmatprep.subr.msk.mxu0 %vm938_vm4, %v5126_v28 }
 0xa09   :  { %v4567_v30 = vpop.eup %4566 }
 0xa0a   :  { %v1275_v31 = vmul.f32 %v4567_v30, %v4563_v22  ;;  %v1596_v39 = vpop.permute.xlu0 %1595 }
 0xa0c   :  { %4191 = vmatmul.mubr.msk.f32.vlgmr.msra.gmra.mrb[4].mxu0 %vm425_vm3, %v1275_v31 }
 0xa0d   :  { %v4569_v32 = vpop.eup %4568  ;;  %4199 = vmatpush3.msk.msra.mxu0 %vm938_vm4, %v5126_v28 }
 0xa0e   :  { %v1276_v34 = vmul.f32 %v4569_v32, %v4565_v24  ;;  %4208 = vmatprep.subr.mxu0 %v4788_v2 }
 0xa10   :  { %4196 = vmatmul.mubr.msk.f32.vlgmr.msra.gmra.mrb[22].mxu1 %vm425_vm3, %v1276_v34 }
 0xa11   :  { %4204 = vmatpush3.xpose.msk.msra.mxu1 %vm273_vm2, %v1518_v33  ;;  %4205 = vmatprep.mubr.msk.f32.mxu1 %vm4789_vm1, %v4788_v2 }
 0xa12   :  { %4213 = vmatprep.subr.mxu1 %v4788_v2 }
 0xa14   :  { %4206 = vmatmul.mubr.msk.f32.vlgmr.msra.gmra.mrb[24].mxu1 %vm273_vm2, %v1516_v35 }
 0xa15   :  { %4215 = vmatprep.mubr.msk.f32.mxu1 %vm4789_vm1, %v4788_v2 }
 0xadf   :  { %v1349_v36 = vpop.f32.mrb[4].mxu0 }
 0xae0   :  { %v4192_v37 = vpop.f32.mrb[5].mxu0  ;;  %4200 = vmatprep.mubr.msk.f32.mxu0 %vm273_vm2, %v1349_v36  ;;  %v5203_v36 = vld [vmem:[#allocation7 + $0x10] sm:$0xff] }
 0xae3   :  { %v1425_v38 = vpop.f32.mrb[22].mxu1 }
 0xae4   :  { %v4197_v40 = vpop.f32.mrb[23].mxu1  ;;  %4201 = vmatmul.mubr.msk.f32.vlgmr.msra.gmra.mrb[2].mxu0 %vm273_vm2, %v1425_v38 }
 0xae5   :  { %4209 = vmatpush3.xpose.msk.msra.mxu0 %vm273_vm2, %v1596_v39  ;;  %4210 = vmatprep.mubr.msk.f32.mxu0 %vm4789_vm1, %v4788_v2 }
 0xae6   :  { %4218 = vmatprep.subr.mxu0 %v4788_v2 }
 0xae7   :  { %v1589_v42 = vpop.f32.mrb[24].mxu1 }
 0xae8   :  { %v4207_v43 = vpop.f32.mrb[25].mxu1  ;;  %4211 = vmatmul.mubr.msk.f32.vlgmr.msra.gmra.mrb[6].mxu0 %vm273_vm2, %v1594_v41  ;;  %v1671_v44 = vsel %vm425_vm3, %v1589_v42, -inf }
 0xae9   :  { %1672 = vmax.xlane.f32.xlu0 %v1671_v44  ;;  %4220 = vmatprep.mubr.msk.f32.mxu0 %vm4789_vm1, %v4788_v2 }
 0xaff   :  { %1693 = vrot.lane.b32.xlu0 %v5026_v60, %s4801_s8 }
 0xb03   :  { %1931 = vrot.lane.b32.xlu0 %v5026_v60, %s4802_s26 }
 0xb07   :  { %2009 = vrot.lane.b32.xlu0 %v5024_v58, %s4802_s26 }
 0xb76   :  { %v1673_v45 = vpop.xlane.xlu0 %1672 }
 0xb77   :  { %v1677_v46 = vsub.f32 %v1589_v42, %v1673_v45 }
 0xb79   :  { %v1679_v47 = vmul.f32 1.442695, %v1677_v46 }
 0xb7a   :  { %v1694_v48 = vpop.permute.xlu0 %1693 }
 0xb7b   :  { %4570 = vpow2.f32 %v1679_v47  ;;  %4214 = vmatpush3.msra.mxu1 %v1694_v48 }
 0xb7c   :  { %4228 = vmatprep.subr.mxu1 %v4788_v2 }
 0xb7e   :  { %v1932_v59 = vpop.permute.xlu0 %1931 }
 0xb82   :  { %v2010_v62 = vpop.permute.xlu0 %2009 }
 0xb85   :  { %v4571_v49 = vpop.eup %4570 }
 0xb86   :  { %v1683_v50 = vsel %vm425_vm3, %v4571_v49, 0.0 }
 0xb87   :  { %1684 = vadd.xlane.f32.xlu1 %v1683_v50 }
 0xb98   :  { %2011 = vrot.lane.b32.xlu1 %v5024_v58, %s4800_s16 }
 0xbbb   :  { %v1667_v51 = vpop.f32.mrb[6].mxu0 }
 0xbbc   :  { %v4212_v52 = vpop.f32.mrb[7].mxu0  ;;  %v1674_v53 = vsel %vm425_vm3, %v1667_v51, -inf }
 0xbbd   :  { %1675 = vmax.xlane.f32.xlu1 %v1674_v53 }
 0xc14   :  { %v1685_v55 = vpop.xlane.xlu1 %1684 }
 0xc15   :  { %4572 = vrcp.f32 %v1685_v55 }
 0xc18   :  { %v2012_v61 = vpop.permute.xlu1 %2011 }
 0xc1f   :  { %v4573_v56 = vpop.eup %4572 }
 0xc20   :  { %v1691_v57 = vmul.f32 %v4573_v56, %v4571_v49 }
 0xc22   :  { %4216 = vmatmul.mubr.msk.f32.vlgmr.msra.gmra.mrb[26].mxu1 %vm425_vm3, %v1691_v57 }
 0xc23   :  { %4229 = vmatpush3.xpose.msk.msra.mxu1 %vm273_vm2, %v1934_v54  ;;  %4230 = vmatprep.mubr.msk.f32.mxu1 %vm4789_vm1, %v4788_v2 }
 0xc24   :  { %4233 = vmatprep.subr.mxu1 %v4788_v2 }
 0xc26   :  { %4231 = vmatmul.mubr.msk.f32.vlgmr.msra.gmra.mrb[28].mxu1 %vm273_vm2, %v1932_v59 }
 0xc27   :  { %4234 = vmatpush3.xpose.msk.msra.mxu1 %vm273_vm2, %v2012_v61  ;;  %4235 = vmatprep.mubr.msk.f32.mxu1 %vm4789_vm1, %v4788_v2 }
 0xc28   :  { %4243 = vmatprep.subr.mxu1 %v4788_v2 }
 0xc2a   :  { %4236 = vmatmul.mubr.msk.f32.vlgmr.msra.gmra.mrb[30].mxu1 %vm273_vm2, %v2010_v62 }
 0xc2b   :  { %4245 = vmatprep.mubr.msk.f32.mxu1 %vm4789_vm1, %v4788_v2 }
 0xc4a   :  { %v1676_v63 = vpop.xlane.xlu1 %1675 }
 0xc4b   :  { %v1678_v0 = vsub.f32 %v1667_v51, %v1676_v63 }
 0xc4d   :  { %v1681_v1 = vmul.f32 1.442695, %v1678_v0 }
 0xc4f   :  { %4574 = vpow2.f32 %v1681_v1 }
 0xc59   :  { %v4575_v3 = vpop.eup %4574 }
 0xc5a   :  { %v1686_v4 = vsel %vm425_vm3, %v4575_v3, 0.0 }
 0xc5b   :  { %1687 = vadd.xlane.f32.xlu0 %v1686_v4 }
 0xc71   :  { %1769 = vrot.lane.b32.xlu0 %v5024_v58, %s4801_s8 }
 0xc75   :  { %2185 = vrot.lane.b32.xlu0 %v5024_v58, %s4803_s17 }
 0xc79   :  { %2349 = vrot.lane.b32.xlu0 %v5026_v60, %s4804_s19 }
 0xc7d   :  { %2347 = vrot.lane.b32.xlu0 %v5026_v60, %s4805_s5 }
 0xc81   :  { %2427 = vrot.lane.b32.xlu0 %v5024_v58, %s4804_s19 }
 0xce8   :  { %v1688_v5 = vpop.xlane.xlu0 %1687 }
 0xce9   :  { %4576 = vrcp.f32 %v1688_v5 }
 0xcec   :  { %v1770_v9 = vpop.permute.xlu0 %1769 }
 0xced   :  { %4219 = vmatpush3.msra.mxu0 %v1770_v9 }
 0xcee   :  { %4223 = vmatprep.subr.msk.mxu0 %vm938_vm4, %v1845_v8 }
 0xcf0   :  { %v2186_v10 = vpop.permute.xlu0 %2185 }
 0xcf1   :  { %4244 = vmatpush3.msra.mxu1 %v2186_v10 }
 0xcf2   :  { %4253 = vmatprep.subr.mxu1 %v4788_v2 }
 0xcf3   :  { %v4577_v11 = vpop.eup %4576 }
 0xcf4   :  { %v1692_v12 = vmul.f32 %v4577_v11, %v4575_v3  ;;  %v2350_v41 = vpop.permute.xlu0 %2349 }
 0xcf5   :  { %v1765_v14 = vpop.f32.mrb[26].mxu1 }
 0xcf6   :  { %v4217_v15 = vpop.f32.mrb[27].mxu1  ;;  %4221 = vmatmul.mubr.msk.f32.vlgmr.msra.gmra.mrb[8].mxu0 %vm425_vm3, %v1692_v12 }
 0xcf7   :  { %4225 = vmatprep.mubr.msk.f32.mxu0 %vm273_vm2, %v1765_v14  ;;  %4224 = vmatpush3.msk.msra.mxu0 %vm938_vm4, %v1845_v8 }
 0xcf8   :  { %4238 = vmatprep.subr.mxu0 %v4788_v2  ;;  %v2348_v43 = vpop.permute.xlu0 %2347 }
 0xcf9   :  { %v2005_v16 = vpop.f32.mrb[28].mxu1 }
 0xcfa   :  { %v4232_v17 = vpop.f32.mrb[29].mxu1  ;;  %v2087_v18 = vsel %vm425_vm3, %v2005_v16, -inf }
 0xcfb   :  { %2088 = vmax.xlane.f32.xlu1 %v2087_v18  ;;  %v2677_v17 = vrot.slane %v5203_v36, 4 }
 0xcfc   :  { %v2428_v47 = vpop.permute.xlu0 %2427 }
 0xcfd   :  { %v2083_v19 = vpop.f32.mrb[30].mxu1 }
 0xcfe   :  { %v4237_v20 = vpop.f32.mrb[31].mxu1  ;;  %v2090_v21 = vsel %vm425_vm3, %v2083_v19, -inf }
 0xcff   :  { %2091 = vmax.xlane.f32.xlu1 %v2090_v21 }
 0xd88   :  { %v2089_v22 = vpop.xlane.xlu1 %2088 }
 0xd89   :  { %v2093_v23 = vsub.f32 %v2005_v16, %v2089_v22 }
 0xd8b   :  { %v2095_v24 = vmul.f32 1.442695, %v2093_v23 }
 0xd8c   :  { %v2092_v25 = vpop.xlane.xlu1 %2091 }
 0xd8d   :  { %4578 = vpow2.f32 %v2095_v24  ;;  %v2094_v26 = vsub.f32 %v2083_v19, %v2092_v25 }
 0xd8f   :  { %v2097_v27 = vmul.f32 1.442695, %v2094_v26 }
 0xd91   :  { %4580 = vpow2.f32 %v2097_v27 }
 0xd97   :  { %v4579_v28 = vpop.eup %4578 }
 0xd98   :  { %v2099_v29 = vsel %vm425_vm3, %v4579_v28, 0.0 }
 0xd99   :  { %2100 = vadd.xlane.f32.xlu1 %v2099_v29 }
 0xd9b   :  { %v4581_v30 = vpop.eup %4580 }
 0xd9c   :  { %v2102_v31 = vsel %vm425_vm3, %v4581_v30, 0.0 }
 0xd9d   :  { %2103 = vadd.xlane.f32.xlu1 %v2102_v31 }
 0xdae   :  { %2109 = vrot.lane.b32.xlu1 %v5026_v60, %s4803_s17 }
 0xdb2   :  { %2425 = vrot.lane.b32.xlu1 %v5024_v58, %s4805_s5 }
 0xdb6   :  { %2765 = vrot.lane.b32.xlu1 %v5026_v60, %s4806_s15 }
 0xdc9   :  { %v1841_v32 = vpop.f32.mrb[8].mxu0 }
 0xdca   :  { %v4222_v33 = vpop.f32.mrb[9].mxu0  ;;  %4226 = vmatmul.mubr.msk.f32.vlgmr.msra.gmra.mrb[2].mxu0 %vm273_vm2, %v1841_v32 }
 0xdcb   :  { %4240 = vmatprep.mubr.msk.f32.mxu0 %vm4789_vm1, %v4788_v2 }
 0xe26   :  { %v2101_v34 = vpop.xlane.xlu1 %2100 }
 0xe27   :  { %4582 = vrcp.f32 %v2101_v34 }
 0xe2a   :  { %v2104_v35 = vpop.xlane.xlu1 %2103 }
 0xe2b   :  { %4584 = vrcp.f32 %v2104_v35 }
 0xe2e   :  { %v2110_v37 = vpop.permute.xlu1 %2109 }
 0xe2f   :  { %4239 = vmatpush3.msra.mxu0 %v2110_v37 }
 0xe30   :  { %4248 = vmatprep.subr.msk.mxu0 %vm938_vm4, %v5203_v36 }
 0xe31   :  { %v4583_v38 = vpop.eup %4582 }
 0xe32   :  { %v2107_v39 = vmul.f32 %v4583_v38, %v4579_v28  ;;  %v2426_v49 = vpop.permute.xlu1 %2425 }
 0xe34   :  { %4241 = vmatmul.mubr.msk.f32.vlgmr.msra.gmra.mrb[10].mxu0 %vm425_vm3, %v2107_v39 }
 0xe35   :  { %v4585_v40 = vpop.eup %4584  ;;  %4249 = vmatpush3.msk.msra.mxu0 %vm938_vm4, %v5203_v36 }
 0xe36   :  { %v2108_v42 = vmul.f32 %v4585_v40, %v4581_v30  ;;  %4258 = vmatprep.subr.mxu0 %v4788_v2  ;;  %v2766_v0 = vpop.permute.xlu1 %2765 }
 0xe38   :  { %4246 = vmatmul.mubr.msk.f32.vlgmr.msra.gmra.mrb[32].mxu1 %vm425_vm3, %v2108_v42 }
 0xe39   :  { %4254 = vmatpush3.xpose.msk.msra.mxu1 %vm273_vm2, %v2350_v41  ;;  %4255 = vmatprep.mubr.msk.f32.mxu1 %vm4789_vm1, %v4788_v2 }
 0xe3a   :  { %4263 = vmatprep.subr.mxu1 %v4788_v2 }
 0xe3c   :  { %4256 = vmatmul.mubr.msk.f32.vlgmr.msra.gmra.mrb[34].mxu1 %vm273_vm2, %v2348_v43 }
 0xe3d   :  { %4265 = vmatprep.mubr.msk.f32.mxu1 %vm4789_vm1, %v4788_v2 }
 0xf07   :  { %v2181_v44 = vpop.f32.mrb[10].mxu0 }
 0xf08   :  { %v4242_v45 = vpop.f32.mrb[11].mxu0  ;;  %4250 = vmatprep.mubr.msk.f32.mxu0 %vm273_vm2, %v2181_v44  ;;  %v5278_v44 = vld [vmem:[#allocation7 + $0x18] sm:$0xff] }
 0xf0b   :  { %v2257_v46 = vpop.f32.mrb[32].mxu1 }
 0xf0c   :  { %v4247_v48 = vpop.f32.mrb[33].mxu1  ;;  %4251 = vmatmul.mubr.msk.f32.vlgmr.msra.gmra.mrb[2].mxu0 %vm273_vm2, %v2257_v46 }
 0xf0d   :  { %4259 = vmatpush3.xpose.msk.msra.mxu0 %vm273_vm2, %v2428_v47  ;;  %4260 = vmatprep.mubr.msk.f32.mxu0 %vm4789_vm1, %v4788_v2 }
 0xf0e   :  { %4268 = vmatprep.subr.mxu0 %v4788_v2 }
 0xf0f   :  { %v2421_v50 = vpop.f32.mrb[34].mxu1 }
 0xf10   :  { %v4257_v51 = vpop.f32.mrb[35].mxu1  ;;  %4261 = vmatmul.mubr.msk.f32.vlgmr.msra.gmra.mrb[12].mxu0 %vm273_vm2, %v2426_v49  ;;  %v2503_v52 = vsel %vm425_vm3, %v2421_v50, -inf }
 0xf11   :  { %2504 = vmax.xlane.f32.xlu0 %v2503_v52  ;;  %4270 = vmatprep.mubr.msk.f32.mxu0 %vm4789_vm1, %v4788_v2 }
 0xf27   :  { %2525 = vrot.lane.b32.xlu0 %v5026_v60, %s4807_s20 }
 0xf2b   :  { %2763 = vrot.lane.b32.xlu0 %v5026_v60, %s4808_s21 }
 0xf2f   :  { %2841 = vrot.lane.b32.xlu0 %v5024_v58, %s4808_s21 }
 0xf9e   :  { %v2505_v53 = vpop.xlane.xlu0 %2504 }
 0xf9f   :  { %v2509_v54 = vsub.f32 %v2421_v50, %v2505_v53 }
 0xfa1   :  { %v2511_v55 = vmul.f32 1.442695, %v2509_v54 }
 0xfa2   :  { %v2526_v56 = vpop.permute.xlu0 %2525 }
 0xfa3   :  { %4586 = vpow2.f32 %v2511_v55  ;;  %4264 = vmatpush3.msra.mxu1 %v2526_v56 }
 0xfa4   :  { %4278 = vmatprep.subr.mxu1 %v4788_v2 }
 0xfa6   :  { %v2764_v5 = vpop.permute.xlu0 %2763 }
 0xfaa   :  { %v2842_v9 = vpop.permute.xlu0 %2841 }
 0xfad   :  { %v4587_v57 = vpop.eup %4586 }
 0xfae   :  { %v2515_v59 = vsel %vm425_vm3, %v4587_v57, 0.0 }
 0xfaf   :  { %2516 = vadd.xlane.f32.xlu1 %v2515_v59 }
 0xfc0   :  { %2843 = vrot.lane.b32.xlu1 %v5024_v58, %s4806_s15 }
 0xfe3   :  { %v2499_v61 = vpop.f32.mrb[12].mxu0 }
 0xfe4   :  { %v4262_v62 = vpop.f32.mrb[13].mxu0  ;;  %v2506_v63 = vsel %vm425_vm3, %v2499_v61, -inf }
 0xfe5   :  { %2507 = vmax.xlane.f32.xlu1 %v2506_v63 }
0x103c   :  { %v2517_v1 = vpop.xlane.xlu1 %2516 }
0x103d   :  { %4588 = vrcp.f32 %v2517_v1 }
0x1040   :  { %v2844_v8 = vpop.permute.xlu1 %2843 }
0x1047   :  { %v4589_v3 = vpop.eup %4588 }
0x1048   :  { %v2523_v4 = vmul.f32 %v4589_v3, %v4587_v57 }
0x104a   :  { %4266 = vmatmul.mubr.msk.f32.vlgmr.msra.gmra.mrb[36].mxu1 %vm425_vm3, %v2523_v4 }
0x104b   :  { %4279 = vmatpush3.xpose.msk.msra.mxu1 %vm273_vm2, %v2766_v0  ;;  %4280 = vmatprep.mubr.msk.f32.mxu1 %vm4789_vm1, %v4788_v2 }
0x104c   :  { %4283 = vmatprep.subr.mxu1 %v4788_v2 }
0x104e   :  { %4281 = vmatmul.mubr.msk.f32.vlgmr.msra.gmra.mrb[38].mxu1 %vm273_vm2, %v2764_v5 }
0x104f   :  { %4284 = vmatpush3.xpose.msk.msra.mxu1 %vm273_vm2, %v2844_v8  ;;  %4285 = vmatprep.mubr.msk.f32.mxu1 %vm4789_vm1, %v4788_v2 }
0x1050   :  { %4293 = vmatprep.subr.mxu1 %v4788_v2 }
0x1052   :  { %4286 = vmatmul.mubr.msk.f32.vlgmr.msra.gmra.mrb[40].mxu1 %vm273_vm2, %v2842_v9 }
0x1053   :  { %4295 = vmatprep.mubr.msk.f32.mxu1 %vm4789_vm1, %v4788_v2 }
0x1072   :  { %v2508_v10 = vpop.xlane.xlu1 %2507 }
0x1073   :  { %v2510_v11 = vsub.f32 %v2499_v61, %v2508_v10 }
0x1075   :  { %v2513_v12 = vmul.f32 1.442695, %v2510_v11 }
0x1077   :  { %4590 = vpow2.f32 %v2513_v12 }
0x1081   :  { %v4591_v14 = vpop.eup %4590 }
0x1082   :  { %v2518_v15 = vsel %vm425_vm3, %v4591_v14, 0.0 }
0x1083   :  { %2519 = vadd.xlane.f32.xlu0 %v2518_v15 }
0x1099   :  { %2601 = vrot.lane.b32.xlu0 %v5024_v58, %s4807_s20 }
0x109d   :  { %3017 = vrot.lane.b32.xlu0 %v5024_v58, %s4809_s22 }
0x10a1   :  { %3181 = vrot.lane.b32.xlu0 %v5026_v60, %s4810_s23 }
0x10a5   :  { %3259 = vrot.lane.b32.xlu0 %v5024_v58, %s4810_s23 }
0x10a9   :  { %3179 = vrot.lane.b32.xlu0 %v5026_v60, %s4811_s0 }
0x1110   :  { %v2520_v16 = vpop.xlane.xlu0 %2519 }
0x1111   :  { %4592 = vrcp.f32 %v2520_v16 }
0x1114   :  { %v2602_v18 = vpop.permute.xlu0 %2601 }
0x1115   :  { %4269 = vmatpush3.msra.mxu0 %v2602_v18 }
0x1116   :  { %4273 = vmatprep.subr.msk.mxu0 %vm938_vm4, %v2677_v17 }
0x1118   :  { %v3018_v19 = vpop.permute.xlu0 %3017 }
0x1119   :  { %4294 = vmatpush3.msra.mxu1 %v3018_v19 }
0x111a   :  { %4303 = vmatprep.subr.mxu1 %v4788_v2 }
0x111b   :  { %v4593_v20 = vpop.eup %4592 }
0x111c   :  { %v2524_v21 = vmul.f32 %v4593_v20, %v4591_v14  ;;  %v3182_v46 = vpop.permute.xlu0 %3181 }
0x111d   :  { %v2597_v22 = vpop.f32.mrb[36].mxu1 }
0x111e   :  { %v4267_v23 = vpop.f32.mrb[37].mxu1  ;;  %4271 = vmatmul.mubr.msk.f32.vlgmr.msra.gmra.mrb[14].mxu0 %vm425_vm3, %v2524_v21 }
0x111f   :  { %4275 = vmatprep.mubr.msk.f32.mxu0 %vm273_vm2, %v2597_v22  ;;  %4274 = vmatpush3.msk.msra.mxu0 %vm938_vm4, %v2677_v17 }
0x1120   :  { %4288 = vmatprep.subr.mxu0 %v4788_v2  ;;  %v3260_v50 = vpop.permute.xlu0 %3259 }
0x1121   :  { %v2837_v24 = vpop.f32.mrb[38].mxu1 }
0x1122   :  { %v4282_v25 = vpop.f32.mrb[39].mxu1  ;;  %v2919_v26 = vsel %vm425_vm3, %v2837_v24, -inf }
0x1123   :  { %2920 = vmax.xlane.f32.xlu1 %v2919_v26 }
0x1124   :  { %v3180_v52 = vpop.permute.xlu0 %3179 }
0x1125   :  { %v2915_v27 = vpop.f32.mrb[40].mxu1 }
0x1126   :  { %v4287_v28 = vpop.f32.mrb[41].mxu1  ;;  %v2922_v29 = vsel %vm425_vm3, %v2915_v27, -inf }
0x1127   :  { %2923 = vmax.xlane.f32.xlu1 %v2922_v29 }
0x11b0   :  { %v2921_v30 = vpop.xlane.xlu1 %2920 }
0x11b1   :  { %v2925_v31 = vsub.f32 %v2837_v24, %v2921_v30 }
0x11b3   :  { %v2927_v32 = vmul.f32 1.442695, %v2925_v31 }
0x11b4   :  { %v2924_v33 = vpop.xlane.xlu1 %2923 }
0x11b5   :  { %4594 = vpow2.f32 %v2927_v32  ;;  %v2926_v34 = vsub.f32 %v2915_v27, %v2924_v33  ;;  %v3946_v27 = vld [vmem:[#allocation8] ss:$0 sm:$0xff]  ;;  %v4614_v33 = vld [vmem:[#allocation2 + $0x8] sm:$0xff] }
0x11b7   :  { %v2929_v35 = vmul.f32 1.442695, %v2926_v34 }
0x11b9   :  { %4596 = vpow2.f32 %v2929_v35  ;;  %v4615_v35 = vld [vmem:[#allocation2] sm:$0xff] }
0x11bf   :  { %v4595_v36 = vpop.eup %4594 }
0x11c0   :  { %v2931_v37 = vsel %vm425_vm3, %v4595_v36, 0.0 }
0x11c1   :  { %2932 = vadd.xlane.f32.xlu1 %v2931_v37  ;;  %v3648_v37 = vld [vmem:[%s5466_s9] sm:$0xff] }
0x11c3   :  { %v4597_v38 = vpop.eup %4596 }
0x11c4   :  { %v2934_v39 = vsel %vm425_vm3, %v4597_v38, 0.0 }
0x11c5   :  { %2935 = vadd.xlane.f32.xlu1 %v2934_v39  ;;  %v3651_v39 = vld [vmem:[%s5466_s9 + $0x18] sm:$0xff] }
0x11d6   :  { %2941 = vrot.lane.b32.xlu1 %v5026_v60, %s4809_s22 }
0x11da   :  { %3257 = vrot.lane.b32.xlu1 %v5024_v58, %s4811_s0 }
0x11f1   :  { %v2673_v40 = vpop.f32.mrb[14].mxu0 }
0x11f2   :  { %v4272_v41 = vpop.f32.mrb[15].mxu0  ;;  %4276 = vmatmul.mubr.msk.f32.vlgmr.msra.gmra.mrb[2].mxu0 %vm273_vm2, %v2673_v40 }
0x11f3   :  { %4290 = vmatprep.mubr.msk.f32.mxu0 %vm4789_vm1, %v4788_v2  ;;  %v3652_v41 = vld [vmem:[%s5466_s9 + $0x20] sm:$0xff] }
0x124e   :  { %v2933_v42 = vpop.xlane.xlu1 %2932 }
0x124f   :  { %4598 = vrcp.f32 %v2933_v42  ;;  %v3653_v42 = vld [vmem:[%s5466_s9 + $0x28] sm:$0xff] }
0x1252   :  { %v2936_v43 = vpop.xlane.xlu1 %2935 }
0x1253   :  { %4600 = vrcp.f32 %v2936_v43  ;;  %v4438_v43 = vpack.c.bf16 %v3653_v42, %v3652_v41 }
0x1256   :  { %v2942_v45 = vpop.permute.xlu1 %2941 }
0x1257   :  { %4289 = vmatpush3.msra.mxu0 %v2942_v45 }
0x1258   :  { %4298 = vmatprep.subr.msk.mxu0 %vm938_vm4, %v5278_v44 }
0x1259   :  { %v4599_v47 = vpop.eup %4598 }
0x125a   :  { %v2939_v48 = vmul.f32 %v4599_v47, %v4595_v36  ;;  %v3258_v57 = vpop.permute.xlu1 %3257 }
0x125c   :  { %4291 = vmatmul.mubr.msk.f32.vlgmr.msra.gmra.mrb[16].mxu0 %vm425_vm3, %v2939_v48 }
0x125d   :  { %v4601_v49 = vpop.eup %4600  ;;  %4299 = vmatpush3.msk.msra.mxu0 %vm938_vm4, %v5278_v44 }
0x125e   :  { %v2940_v51 = vmul.f32 %v4601_v49, %v4597_v38  ;;  %4308 = vmatprep.subr.mxu0 %v4788_v2 }
0x1260   :  { %4296 = vmatmul.mubr.msk.f32.vlgmr.msra.gmra.mrb[42].mxu1 %vm425_vm3, %v2940_v51 }
0x1261   :  { %4304 = vmatpush3.xpose.msk.msra.mxu1 %vm273_vm2, %v3182_v46  ;;  %4305 = vmatprep.mubr.msk.f32.mxu1 %vm4789_vm1, %v4788_v2 }
0x1262   :  { %4313 = vmatprep.subr.mxu1 %v4788_v2 }
0x1264   :  { %4306 = vmatmul.mubr.msk.f32.vlgmr.msra.gmra.mrb[44].mxu1 %vm273_vm2, %v3180_v52 }
0x1265   :  { %4315 = vmatprep.mubr.msk.f32.mxu1 %vm4789_vm1, %v4788_v2 }
0x132f   :  { %v3013_v53 = vpop.f32.mrb[16].mxu0 }
0x1330   :  { %v4292_v54 = vpop.f32.mrb[17].mxu0  ;;  %4300 = vmatprep.mubr.msk.f32.mxu0 %vm273_vm2, %v3013_v53 }
0x1331   :  { %v3654_v54 = vld [vmem:[%s5466_s9 + $0x30] sm:$0xff] }
0x1333   :  { %v3089_v55 = vpop.f32.mrb[42].mxu1 }
0x1334   :  { %v4297_v56 = vpop.f32.mrb[43].mxu1  ;;  %4301 = vmatmul.mubr.msk.f32.vlgmr.msra.gmra.mrb[2].mxu0 %vm273_vm2, %v3089_v55  ;;  %v3655_v55 = vld [vmem:[%s5466_s9 + $0x38] sm:$0xff] }
0x1335   :  { %4309 = vmatpush3.xpose.msk.msra.mxu0 %vm273_vm2, %v3260_v50  ;;  %4310 = vmatprep.mubr.msk.f32.mxu0 %vm4789_vm1, %v4788_v2  ;;  %v4442_v56 = vpack.c.bf16 %v3655_v55, %v3654_v54  ;;  %v3950_v54 = vld [vmem:[%s5469_s12] ss:$0 sm:$0xff] }
0x1336   :  { %4318 = vmatprep.subr.mxu0 %v4788_v2 }
0x1337   :  { %v3253_v59 = vpop.f32.mrb[44].mxu1 }
0x1338   :  { %v4307_v61 = vpop.f32.mrb[45].mxu1  ;;  %4311 = vmatmul.mubr.msk.f32.vlgmr.msra.gmra.mrb[18].mxu0 %vm273_vm2, %v3258_v57  ;;  %v3335_v62 = vsel %vm425_vm3, %v3253_v59, -inf  ;;  %v3657_v57 = vld [vmem:[%s5466_s9 + $0x48] sm:$0xff] }
0x1339   :  { %3336 = vmax.xlane.f32.xlu0 %v3335_v62  ;;  %4320 = vmatprep.mubr.msk.f32.mxu0 %vm4789_vm1, %v4788_v2  ;;  %v3509_v2 = vrot.slane %v5278_v44, 4  ;;  %v3659_v62 = vld [vmem:[%s5466_s9 + $0x58] sm:$0xff] }
0x13c6   :  { %v3337_v63 = vpop.xlane.xlu0 %3336 }
0x13c7   :  { %v3341_v0 = vsub.f32 %v3253_v59, %v3337_v63  ;;  %v3658_v59 = vld [vmem:[%s5466_s9 + $0x50] sm:$0xff] }
0x13c8   :  { %v4450_v63 = vpack.c.bf16 %v3659_v62, %v3658_v59 }
0x13c9   :  { %v3343_v1 = vmul.f32 1.442695, %v3341_v0  ;;  %v3660_v0 = vld [vmem:[%s5466_s9 + $0x60] sm:$0xff] }
0x13cb   :  { %4602 = vpow2.f32 %v3343_v1  ;;  %v3661_v1 = vld [vmem:[%s5466_s9 + $0x68] sm:$0xff] }
0x13d5   :  { %v4603_v3 = vpop.eup %4602 }
0x13d6   :  { %v3347_v4 = vsel %vm425_vm3, %v4603_v3, 0.0 }
0x13d7   :  { %3348 = vadd.xlane.f32.xlu0 %v3347_v4  ;;  %v3662_v4 = vld [vmem:[%s5466_s9 + $0x70] sm:$0xff] }
0x140b   :  { %v3331_v5 = vpop.f32.mrb[18].mxu0 }
0x140c   :  { %v4312_v8 = vpop.f32.mrb[19].mxu0  ;;  %v3338_v9 = vsel %vm425_vm3, %v3331_v5, -inf }
0x140d   :  { %3339 = vmax.xlane.f32.xlu1 %v3338_v9  ;;  %v3748_v9 = vld [vmem:[%s5468_s11] sm:$0xff] }
0x141e   :  { %3433 = vrot.lane.b32.xlu1 %v5024_v58, %s4812_s3 }
0x1464   :  { %v3349_v17 = vpop.xlane.xlu0 %3348 }
0x149a   :  { %v3340_v10 = vpop.xlane.xlu1 %3339 }
0x149b   :  { %v3342_v11 = vsub.f32 %v3331_v5, %v3340_v10  ;;  %v3663_v5 = vld [vmem:[%s5466_s9 + $0x78] sm:$0xff]  ;;  %v3749_v10 = vld [vmem:[%s5468_s11 + $0x8] sm:$0xff] }
0x149c   :  { %v4458_v8 = vpack.c.bf16 %v3663_v5, %v3662_v4 }
0x149d   :  { %v3345_v12 = vmul.f32 1.442695, %v3342_v11  ;;  %v3750_v11 = vld [vmem:[%s5468_s11 + $0x10] sm:$0xff] }
0x149e   :  { %v3434_v14 = vpop.permute.xlu1 %3433 }
0x149f   :  { %4604 = vpow2.f32 %v3345_v12  ;;  %4319 = vmatpush3.msra.mxu0 %v3434_v14  ;;  %v3751_v12 = vld [vmem:[%s5468_s11 + $0x18] sm:$0xff] }
0x14a0   :  { %4323 = vmatprep.subr.msk.mxu0 %vm938_vm4, %v3509_v2  ;;  %4606 = vrcp.f32 %v3349_v17  ;;  %v4466_v14 = vpack.c.bf16 %v3751_v12, %v3750_v11 }
0x14a9   :  { %v4605_v15 = vpop.eup %4604 }
0x14aa   :  { %v3350_v16 = vsel %vm425_vm3, %v4605_v15, 0.0  ;;  %v4607_v58 = vpop.eup %4606 }
0x14ab   :  { %3351 = vadd.xlane.f32.xlu0 %v3350_v16  ;;  %v3355_v19 = vmul.f32 %v4607_v58, %v4603_v3  ;;  %v4454_v3 = vpack.c.bf16 %v3661_v1, %v3660_v0  ;;  %v3753_v16 = vld [vmem:[%s5468_s11 + $0x28] sm:$0xff]  ;;  %v3755_v58 = vld [vmem:[%s5468_s11 + $0x38] sm:$0xff] }
0x14c1   :  { %3357 = vrot.lane.b32.xlu0 %v5026_v60, %s4812_s3 }
0x1538   :  { %v3352_v18 = vpop.xlane.xlu0 %3351 }
0x1539   :  { %4608 = vrcp.f32 %v3352_v18  ;;  %v3754_v18 = vld [vmem:[%s5468_s11 + $0x30] sm:$0xff] }
0x153c   :  { %v3358_v20 = vpop.permute.xlu0 %3357 }
0x153d   :  { %4314 = vmatpush3.msra.mxu1 %v3358_v20  ;;  %v3756_v20 = vld [vmem:[%s5468_s11 + $0x40] sm:$0xff] }
0x153e   :  { %4316 = vmatmul.mubr.msk.f32.vlgmr.msra.gmra.mrb[46].mxu1 %vm425_vm3, %v3355_v19  ;;  %v4474_v19 = vpack.c.bf16 %v3755_v58, %v3754_v18 }
0x1543   :  { %v4609_v21 = vpop.eup %4608 }
0x1544   :  { %v3356_v22 = vmul.f32 %v4609_v21, %v4605_v15  ;;  %v3752_v15 = vld [vmem:[%s5468_s11 + $0x20] sm:$0xff]  ;;  %v3757_v21 = vld [vmem:[%s5468_s11 + $0x48] sm:$0xff] }
0x1545   :  { %v4470_v17 = vpack.c.bf16 %v3753_v16, %v3752_v15 }
0x1546   :  { %4321 = vmatmul.mubr.msk.f32.vlgmr.msra.gmra.mrb[20].mxu0 %vm425_vm3, %v3356_v22  ;;  %v4478_v22 = vpack.c.bf16 %v3757_v21, %v3756_v20 }
0x1547   :  { %4324 = vmatpush3.msk.msra.mxu0 %vm938_vm4, %v3509_v2  ;;  %v4462_v2 = vpack.c.bf16 %v3749_v10, %v3748_v9 }
0x1549   :  { %4463 = vmatprep.subr.bf16.mxu0 %v4462_v2 }
0x1611   :  { %v3429_v23 = vpop.f32.mrb[46].mxu1 }
0x1612   :  { %v4317_v24 = vpop.f32.mrb[47].mxu1  ;;  %4325 = vmatprep.mubr.msk.f32.mxu0 %vm273_vm2, %v3429_v23  ;;  %v3758_v23 = vld [vmem:[%s5468_s11 + $0x50] sm:$0xff] }
0x1613   :  { %v3759_v24 = vld [vmem:[%s5468_s11 + $0x58] sm:$0xff] }
0x1619   :  { %v3505_v60 = vpop.f32.mrb[20].mxu0 }
0x161a   :  { %v4322_v25 = vpop.f32.mrb[21].mxu0  ;;  %4326 = vmatmul.mubr.msk.f32.vlgmr.msra.gmra.mrb[2].mxu0 %vm273_vm2, %v3505_v60  ;;  %v4482_v60 = vpack.c.bf16 %v3759_v24, %v3758_v23 }
0x161b   :  { %4465 = vmatpush3.bf16.msra.mxu0 %v4462_v2  ;;  %v3760_v25 = vld [vmem:[%s5468_s11 + $0x60] sm:$0xff] }
0x161c   :  { %4467 = vmatprep.subr.bf16.mxu0 %v4466_v14 }
0x161f   :  { %4469 = vmatpush3.bf16.msra.mxu0 %v4466_v14 }
0x1620   :  { %4471 = vmatprep.subr.bf16.mxu0 %v4470_v17 }
0x1623   :  { %4473 = vmatpush3.bf16.msra.mxu0 %v4470_v17 }
0x1624   :  { %4475 = vmatprep.subr.bf16.mxu0 %v4474_v19 }
0x1627   :  { %4477 = vmatpush3.bf16.msra.mxu0 %v4474_v19 }
0x1628   :  { %4479 = vmatprep.subr.bf16.mxu0 %v4478_v22 }
0x162b   :  { %4481 = vmatpush3.bf16.msra.mxu0 %v4478_v22 }
0x162c   :  { %4483 = vmatprep.subr.bf16.mxu0 %v4482_v60 }
0x162f   :  { %4485 = vmatpush3.bf16.msra.mxu0 %v4482_v60 }
0x16ed   :  { %v4327_v26 = vpop.f32.mrb[2].mxu0 }
0x16ee   :  { %v4494_v28 = vadd.f32 %v4327_v26, %v5109_v6  ;;  %v3584_v29 = vpop.f32.mrb[3].mxu0  ;;  %v3649_v6 = vld [vmem:[%s5466_s9 + $0x8] sm:$0xff] }
0x16ef   :  { %v4495_v30 = vadd.f32 %v3584_v29, %v5111_v7  ;;  %v3650_v7 = vld [vmem:[%s5466_s9 + $0x10] sm:$0xff]  ;;  %v4430_v38 = vpack.c.bf16 %v3649_v6, %v3648_v37  ;;  %v3761_v26 = vld [vmem:[%s5468_s11 + $0x68] sm:$0xff] }
0x16f0   :  { %v3603_v31 = vadd.f32 %v4494_v28, %v3946_v27  ;;  %v4434_v40 = vpack.c.bf16 %v3651_v39, %v3650_v7  ;;  %v3947_v37 = vld [vmem:[#allocation10] ss:$0 sm:$0xff]  ;;  %v3948_v39 = vld [vmem:[#allocation11] ss:$0 sm:$0xff] }
0x16f1   :  { %v3602_v32 = vadd.f32 %v4495_v30, %v3946_v27  ;;  %4431 = vmatprep.subr.bf16.mxu1 %v4430_v38  ;;  %v4486_v27 = vpack.c.bf16 %v3761_v26, %v3760_v25 }
0x16f2   :  { %v5318_v34 = vadd.f32 %v4614_v33, %v3603_v31  ;;  %4433 = vmatpush3.bf16.msra.mxu1 %v4430_v38 }
0x16f3   :  { %v5320_v36 = vadd.f32 %v4615_v35, %v3602_v32  ;;  %4435 = vmatprep.subr.bf16.mxu1 %v4434_v40  ;;  %4487 = vmatprep.subr.bf16.mxu0 %v4486_v27 }
0x16f4   :  { %3610 = vadd.xlane.f32.xlu0 %v5318_v34  ;;  %4489 = vmatpush3.bf16.msra.mxu0 %v4486_v27 }
0x16f5   :  { %3608 = vadd.xlane.f32.xlu1 %v5320_v36 }
0x16f6   :  { %4437 = vmatpush3.bf16.msra.mxu1 %v4434_v40 }
0x16f7   :  { %4439 = vmatprep.subr.bf16.mxu1 %v4438_v43 }
0x16fa   :  { %4441 = vmatpush3.bf16.msra.mxu1 %v4438_v43 }
0x16fb   :  { %4443 = vmatprep.subr.bf16.mxu1 %v4442_v56 }
0x16fe   :  { %4445 = vmatpush3.bf16.msra.mxu1 %v4442_v56 }
0x1781   :  { %v3611_v44 = vpop.xlane.xlu0 %3610 }
0x1782   :  { %v3613_v45 = vmul.f32 0.03125, %v3611_v44  ;;  %v3609_v46 = vpop.xlane.xlu1 %3608  ;;  %v3762_v44 = vld [vmem:[%s5468_s11 + $0x70] sm:$0xff] }
0x1783   :  { %v3612_v47 = vmul.f32 0.03125, %v3609_v46 }
0x1784   :  { %v3615_v48 = vsub.f32 %v5318_v34, %v3613_v45  ;;  %v3763_v45 = vld [vmem:[%s5468_s11 + $0x78] sm:$0xff]  ;;  %s4813_s11 = smov [#allocation13]  }
0x1785   :  { %v3614_v49 = vsub.f32 %v5320_v36, %v3612_v47  ;;  %v4490_v46 = vpack.c.bf16 %v3763_v45, %v3762_v44  ;;  %v3949_v47 = vld [vmem:[%s5467_s10] ss:$0 sm:$0xff]  ;;  %s3855_s20 = sshll.u32 %s4813_s11, 4  ;;  %s3856_s20 = int_to_ptr.vmem [resolvable:$true] %s3855_s20 }
0x1786   :  { %v5345_v50 = vmul.f32 %v4976_v13, %v3615_v48  ;;  %s4748_s10 = scalar_lea.vmem %s3856_s20, 256  ;;  %p4753_p7 = scmp.lt.s32.totalorder %s3856_s20, %s3856_s20 }
0x1787   :  { %v5348_v51 = vmul.f32 %v4976_v13, %v3614_v49  ;;  %v3656_v13 = vld [vmem:[%s5466_s9 + $0x40] sm:$0xff]  ;;  %4491 = vmatprep.subr.bf16.mxu0 %v4490_v46  ;;  %p4749_p6 = scmp.ne.s32.totalorder %s3856_s20, %s4748_s10  ;;  %p4754_p8 = scmp.lt.s32.totalorder %s4748_s10, %s4748_s10 }
0x1788   :  { %v3619_v52 = vmul.f32 %v5345_v50, %v5345_v50  ;;  %v4446_v61 = vpack.c.bf16 %v3657_v57, %v3656_v13  ;;  %4493 = vmatpush3.bf16.msra.mxu0 %v4490_v46 }
0x1789   :  { %v3618_v53 = vmul.f32 %v5348_v51, %v5348_v51  ;;  %p4755_p9 = por %p4754_p8, %p4753_p7 }
0x178a   :  { %3622 = vadd.xlane.f32.xlu1 %v3619_v52  ;;  %4447 = vmatprep.subr.bf16.mxu1 %v4446_v61 }
0x178b   :  { %3620 = vadd.xlane.f32.xlu0 %v3618_v53  ;;  %4449 = vmatpush3.bf16.msra.mxu1 %v4446_v61  ;;  %p4756_p10 = pnand %p4755_p9, %p4749_p6 }
0x178c   :  { %4451 = vmatprep.subr.bf16.mxu1 %v4450_v63 }
0x178f   :  { %4453 = vmatpush3.bf16.msra.mxu1 %v4450_v63 }
0x1790   :  { %4455 = vmatprep.subr.bf16.mxu1 %v4454_v3 }
0x1793   :  { %4457 = vmatpush3.bf16.msra.mxu1 %v4454_v3 }
0x1794   :  { %4459 = vmatprep.subr.bf16.mxu1 %v4458_v8 }
0x1797   :  { %4461 = vmatpush3.bf16.msra.mxu1 %v4458_v8 }
0x1817   :  { %v3623_v28 = vpop.xlane.xlu1 %3622 }
0x1818   :  { %v3625_v29 = vmul.f32 0.03125, %v3623_v28  ;;  %v3621_v30 = vpop.xlane.xlu0 %3620 }
0x1819   :  { %v3624_v31 = vmul.f32 0.03125, %v3621_v30 }
0x181a   :  { %v3627_v32 = vadd.f32 1e-05, %v3625_v29 }
0x181b   :  { %v3626_v33 = vadd.f32 1e-05, %v3624_v31 }
0x181c   :  { %4610 = vrsqrt.f32 %v3627_v32 }
0x181d   :  { %4612 = vrsqrt.f32 %v3626_v33 }
0x1826   :  { %v4611_v35 = vpop.eup %4610 }
0x1827   :  { %v4613_v6 = vpop.eup %4612  ;;  %v3631_v7 = vmul.f32 %v4611_v35, %v5345_v50 }
0x1828   :  { %v3630_v38 = vmul.f32 %v4613_v6, %v5348_v51 }
0x1829   :  { %v3639_v40 = vmul.f32 %v3947_v37, %v3631_v7 }
0x182a   :  { %v3638_v41 = vmul.f32 %v3947_v37, %v3630_v38 }
0x182b   :  { %v3647_v43 = vadd.f32 %v3948_v39, %v3639_v40 }
0x182c   :  { %v3646_v42 = vadd.f32 %v3948_v39, %v3638_v41 }
0x182e   :  { %4360 = vmatprep.mubr.f32.mxu1 %v3646_v42 }
0x182f   :  { %4361 = vmatmul.mubr.f32.vlgmr.msra.gmra.mrb[48].mxu1 %v3647_v43 }
0x1902   :  { %v4362_v48 = vpop.f32.mrb[48].mxu1 }
0x1903   :  { %v3743_v49 = vadd.f32 %v4362_v48, %v3949_v47  ;;  %v3737_v50 = vpop.f32.mrb[49].mxu1 }
0x1904   :  { %v3738_v51 = vadd.f32 %v3949_v47, %v3737_v50 }
0x1905   :  { %v3747_v53 = vmax.f32 %v3743_v49, 0.0 }
0x1906   :  { %v3746_v52 = vmax.f32 %v3738_v51, 0.0 }
0x1908   :  { %4395 = vmatprep.mubr.f32.mxu0 %v3746_v52 }
0x1909   :  { %4396 = vmatmul.mubr.f32.vlgmr.msra.gmra.mrb[22].mxu0 %v3747_v53 }
0x19dc   :  { %v4397_v55 = vpop.f32.mrb[22].mxu0 }
0x19dd   :  { %v3843_v56 = vadd.f32 %v4397_v55, %v3950_v54  ;;  %v3837_v13 = vpop.f32.mrb[23].mxu0 }
0x19de   :  { %v3838_v57 = vadd.f32 %v3950_v54, %v3837_v13 }
0x19df   :  { %v3847_v59 = vadd.f32 %v3843_v56, %v5318_v34 }
0x19e0   :  { %v3846_v61 = vadd.f32 %v3838_v57, %v5320_v36 }
0x19e1   :  { %3849 = vst [vmem:[#allocation13 + $0x8] sm:$0xff] %v3847_v59 }
0x19e2   :  { %3848 = vst [vmem:[#allocation13] sm:$0xff] %v3846_v61 }
0x19e3   :  { %4759 = shalt.err (!%p4756_p10)
}
0x19e4   :  { %s4760_s22 = scalar_lea.hbm %s5470_s13, 256 }
0x19e5   :  { %p4761_p11 = scmp.ne.s32.totalorder %s5470_s13, %s4760_s22  ;;  %p4764_p12 = scmp.lt.u32.totalorder %s4760_s22, %s5470_s13 }
0x19e7   :  { %p4766_p13 = pnand %p4764_p12, %p4761_p11 }
0x19e9   :  { %4769 = shalt.err (!%p4766_p13)
}
0x19ea   :  { %3861 = dma.vmem_to_hbm [thread:$0]  %s3856_s20, 256, %s5470_s13, [#allocation4], %s4783_s6, %s4783_s6, %s4784_s28  }
0x19eb   :  { %4778 = dma.done.wait [#allocation4], 256  }
0x19ec   :  { %4779 = vsyncadd [#allocation4], 4294967040 }
0x19ed   :  { %3865 = vsyncpa [#allocation3], 1 }
0x19ee   :  { %3866 = vsyncpa [#allocation6], 1 }
0x19ef   :  { %3867 = vsyncpa [#allocation9], 1 }
0x19f0   :  { %3868 = vsyncpa [#allocation12], 1 }
0x19f1   :  { %3869 = vsyncpa [#allocation4], 1 }

</bundles_post_ra>
